<compile_context>
chip_gen: v7x
topology: tpu7x:2x2x1
jax: 0.10.0
libtpu: 0.0.40
codegen_flags: <defaults>
</compile_context>

<pallas_src>
import functools

import jax
import jax.numpy as jnp
from jax.experimental import pallas as pl
from jax.experimental.pallas import tpu as pltpu


def _leaky_relu(x, slope=0.1):
    return jnp.where(x >= 0, x, slope * x)


def _conv_resblock_kernel(
    x_ref,        # (in_ch, TL)              input tile (f32), positions on lanes
    w_in_ref,     # (ch, in_ch)              bf16
    b_in_ref,     # (ch, 1)                  f32
    w1_ref,       # (block_num, ch, ch)      bf16
    b1_ref,       # (block_num, ch, 1)       f32
    w2_ref,       # (block_num, ch, ch)      bf16
    b2_ref,       # (block_num, ch, 1)       f32
    w_out_ref,    # (out_ch, ch)             bf16
    b_out_ref,    # (out_ch, 1)              f32
    o_ref,        # (out_ch, TL)             output tile (f32)
    *,
    block_num: int,
):
    x = x_ref[...].astype(jnp.bfloat16)                       # (in_ch, TL)

    # in_conv: Conv1d(in_ch, ch, k=1) + LeakyReLU(0.1)
    h = jnp.dot(w_in_ref[...], x, preferred_element_type=jnp.float32)
    h = _leaky_relu(h + b_in_ref[...])                        # (ch, TL) f32

    # residual blocks: conv -> leaky -> conv -> (+residual) -> leaky.
    # Unrolled Python loop keeps all dots visible to the LLO scheduler so the
    # VPU elementwise work co-issues under MXU latency.
    for i in range(block_num):
        h0 = h
        t = jnp.dot(w1_ref[i], h.astype(jnp.bfloat16),
                    preferred_element_type=jnp.float32)
        t = _leaky_relu(t + b1_ref[i])
        t = jnp.dot(w2_ref[i], t.astype(jnp.bfloat16),
                    preferred_element_type=jnp.float32)
        h = _leaky_relu(t + b2_ref[i] + h0)

    # out_conv: Conv1d(ch, out_ch, k=1), then final ReLU (is_relu=True)
    y = jnp.dot(w_out_ref[...], h.astype(jnp.bfloat16),
                preferred_element_type=jnp.float32)
    o_ref[...] = jnp.maximum(y + b_out_ref[...], 0.0).astype(o_ref.dtype)


def conv_resblock_pallas(x_ncl, params, *, block_num=3, tl=1024):
    """x_ncl: (B, in_ch, L) float32. Returns (B, out_ch, L) float32.

    The wrapper flattens (B, C, L) -> (C, B*L) (pure layout plumbing) so the
    kernel works on one lane-dense slab.  tl is the position tile (lane dim):
    for B*L <= tl a single full tile is used, otherwise B*L is zero-padded up
    to a multiple of tl (padded columns sliced off afterwards).  tl should be
    a multiple of 128; per-tile live activations are only tl*ch*4 B each, so
    even tl=2048 is ~1 MiB -- sweep 512-2048 on big inputs.
    """
    B, in_ch, L = x_ncl.shape
    w_in, b_in, w1, b1, w2, b2, w_out, b_out = params
    ch = w_in.shape[0]
    out_ch = w_out.shape[0]

    # Fold batch into the position axis: (B, in_ch, L) -> (in_ch, B*L).
    N = B * L
    x_flat = jnp.transpose(x_ncl, (1, 0, 2)).reshape(in_ch, N)

    if N <= tl:
        tl_eff = N
        N_pad = N
    else:
        tl_eff = tl
        N_pad = pl.cdiv(N, tl_eff) * tl_eff
        if N_pad != N:
            x_flat = jnp.pad(x_flat, ((0, 0), (0, N_pad - N)))

    # bf16 matmul operands (halves weight DMA bytes, ~3x MXU throughput on
    # v6e/v7x, supported on v5e); accumulation and all elementwise math stay
    # f32 inside the kernel.
    w_in_b = w_in.astype(jnp.bfloat16)
    w1_b = w1.astype(jnp.bfloat16)
    w2_b = w2.astype(jnp.bfloat16)
    w_out_b = w_out.astype(jnp.bfloat16)

    kernel = functools.partial(_conv_resblock_kernel, block_num=block_num)

    flops = 2 * N_pad * (in_ch * ch + 2 * block_num * ch * ch + ch * out_ch)
    bytes_accessed = (
        N_pad * in_ch * 4
        + N_pad * out_ch * 4
        + sum(a.size * a.dtype.itemsize
              for a in (w_in_b, b_in, w1_b, b1, w2_b, b2, w_out_b, b_out)))
    cost = pl.CostEstimate(flops=flops, transcendentals=0,
                           bytes_accessed=bytes_accessed)

    # Weight BlockSpecs have constant index maps, so Pallas fetches them once
    # and keeps them VMEM-resident across grid steps (double-buffer overhead
    # at ch=128 is <1 MiB, so no need for pl.Buffered(1)).
    out_flat = pl.pallas_call(
        kernel,
        out_shape=jax.ShapeDtypeStruct((out_ch, N_pad), jnp.float32),
        grid_spec=pltpu.PrefetchScalarGridSpec(
            num_scalar_prefetch=0,
            grid=(N_pad // tl_eff,),
            in_specs=[
                pl.BlockSpec((in_ch, tl_eff), lambda l: (0, l)),            # x slab
                pl.BlockSpec((ch, in_ch), lambda l: (0, 0)),                # w_in
                pl.BlockSpec((ch, 1), lambda l: (0, 0)),                    # b_in
                pl.BlockSpec((block_num, ch, ch), lambda l: (0, 0, 0)),     # w1
                pl.BlockSpec((block_num, ch, 1), lambda l: (0, 0, 0)),      # b1
                pl.BlockSpec((block_num, ch, ch), lambda l: (0, 0, 0)),     # w2
                pl.BlockSpec((block_num, ch, 1), lambda l: (0, 0, 0)),      # b2
                pl.BlockSpec((out_ch, ch), lambda l: (0, 0)),               # w_out
                pl.BlockSpec((out_ch, 1), lambda l: (0, 0)),                # b_out
            ],
            out_specs=pl.BlockSpec((out_ch, tl_eff), lambda l: (0, l)),
        ),
        compiler_params=pltpu.CompilerParams(
            dimension_semantics=("parallel",)),
        cost_estimate=cost,
    )(x_flat, w_in_b, b_in, w1_b, b1, w2_b, b2, w_out_b, b_out)

    if N_pad != N:
        out_flat = out_flat[:, :N]
    # (out_ch, B*L) -> (B, out_ch, L)
    return jnp.transpose(out_flat.reshape(out_ch, B, L), (1, 0, 2))


def conv_resblock_ref(x_ncl, params, *, block_num=3):
    """Pure-JAX f32 reference matching the PyTorch forward semantics."""
    w_in, b_in, w1, b1, w2, b2, w_out, b_out = params

    def conv(w, b, x):  # w:(O,I), b:(O,1), x:(B,I,L) -> (B,O,L)
        return jnp.einsum('oi,bil->bol', w, x) + b[None]

    def leaky(v):
        return jnp.where(v >= 0, v, 0.1 * v)

    h = leaky(conv(w_in, b_in, x_ncl))
    for i in range(block_num):
        h0 = h
        t = leaky(conv(w1[i], b1[i], h))
        t = conv(w2[i], b2[i], t)
        h = leaky(t + h0)
    return jnp.maximum(conv(w_out, b_out, h), 0.0)


def init_params(key, in_ch, ch, out_ch, block_num):
    """Deterministic synthetic parameters. Conv1d weight (out, in, 1) stored
    squeezed as (out, in) so the kernel computes W @ x (channels-first)."""
    ks = jax.random.split(key, 8)
    scale = 0.05
    w_in = scale * jax.random.normal(ks[0], (ch, in_ch), jnp.float32)
    b_in = scale * jax.random.normal(ks[1], (ch, 1), jnp.float32)
    w1 = scale * jax.random.normal(ks[2], (block_num, ch, ch), jnp.float32)
    b1 = scale * jax.random.normal(ks[3], (block_num, ch, 1), jnp.float32)
    w2 = scale * jax.random.normal(ks[4], (block_num, ch, ch), jnp.float32)
    b2 = scale * jax.random.normal(ks[5], (block_num, ch, 1), jnp.float32)
    w_out = scale * jax.random.normal(ks[6], (out_ch, ch), jnp.float32)
    b_out = scale * jax.random.normal(ks[7], (out_ch, 1), jnp.float32)
    return (w_in, b_in, w1, b1, w2, b2, w_out, b_out)


if __name__ == "__main__":
    # Small shapes: conv_resblock(in_ch=16, ch=128, out_ch=16, block_num=3, is_relu=True)
    B, in_ch, L = 2, 16, 16
    ch, out_ch, block_num = 128, 16, 3

    key = jax.random.PRNGKey(0)
    kx, kp = jax.random.split(key)
    x = jax.random.normal(kx, (B, in_ch, L), jnp.float32)
    params = init_params(kp, in_ch, ch, out_ch, block_num)

    out = conv_resblock_pallas(x, params, block_num=block_num, tl=1024)
    out = jax.block_until_ready(out)

    ref = conv_resblock_ref(x, params, block_num=block_num)
    assert out.shape == (B, out_ch, L), out.shape
    # bf16 matmul operands in the kernel vs f32 reference -> looser tolerance.
    assert jnp.allclose(out, ref, atol=3e-2, rtol=3e-2), float(jnp.max(jnp.abs(out - ref)))

    print("KERNEL_OK")
</pallas_src>

<mosaic_0001>
module attributes {stable_mosaic.version = 11 : i64} {
  func.func @_conv_resblock_kernel(%arg0: i32, %arg1: memref<16x32xf32, #tpu.memory_space<vmem>>, %arg2: memref<128x16xbf16, #tpu.memory_space<vmem>>, %arg3: memref<128x1xf32, #tpu.memory_space<vmem>>, %arg4: memref<3x128x128xbf16, #tpu.memory_space<vmem>>, %arg5: memref<3x128x1xf32, #tpu.memory_space<vmem>>, %arg6: memref<3x128x128xbf16, #tpu.memory_space<vmem>>, %arg7: memref<3x128x1xf32, #tpu.memory_space<vmem>>, %arg8: memref<16x128xbf16, #tpu.memory_space<vmem>>, %arg9: memref<16x1xf32, #tpu.memory_space<vmem>>, %arg10: memref<16x32xf32, #tpu.memory_space<vmem>>) attributes {dimension_semantics = [#tpu.dimension_semantics<parallel>], iteration_bounds = array<i64: 1>, scalar_prefetch = 0 : i64, scratch_operands = 0 : i64, tpu.core_type = #tpu.core_type<tc>, window_params = [{transform_indices = @transform_0, window_bounds = array<i64: 16, 32>}, {pipeline_mode = #tpu.pipeline_mode<synchronous>, transform_indices = @transform_1, window_bounds = array<i64: 128, 16>}, {pipeline_mode = #tpu.pipeline_mode<synchronous>, transform_indices = @transform_2, window_bounds = array<i64: 128, 1>}, {pipeline_mode = #tpu.pipeline_mode<synchronous>, transform_indices = @transform_3, window_bounds = array<i64: 3, 128, 128>}, {pipeline_mode = #tpu.pipeline_mode<synchronous>, transform_indices = @transform_4, window_bounds = array<i64: 3, 128, 1>}, {pipeline_mode = #tpu.pipeline_mode<synchronous>, transform_indices = @transform_5, window_bounds = array<i64: 3, 128, 128>}, {pipeline_mode = #tpu.pipeline_mode<synchronous>, transform_indices = @transform_6, window_bounds = array<i64: 3, 128, 1>}, {pipeline_mode = #tpu.pipeline_mode<synchronous>, transform_indices = @transform_7, window_bounds = array<i64: 16, 128>}, {pipeline_mode = #tpu.pipeline_mode<synchronous>, transform_indices = @transform_8, window_bounds = array<i64: 16, 1>}, {transform_indices = @transform_9, window_bounds = array<i64: 16, 32>}]} {
    %c0 = arith.constant 0 : index
    %c0_0 = arith.constant 0 : index
    %0 = vector.load %arg1[%c0, %c0_0] : memref<16x32xf32, #tpu.memory_space<vmem>>, vector<16x32xf32>
    %1 = arith.truncf %0 : vector<16x32xf32> to vector<16x32xbf16>
    %c0_1 = arith.constant 0 : index
    %c0_2 = arith.constant 0 : index
    %2 = vector.load %arg2[%c0_1, %c0_2] : memref<128x16xbf16, #tpu.memory_space<vmem>>, vector<128x16xbf16>
    %cst = arith.constant dense<0.000000e+00> : vector<128x32xf32>
    %3 = tpu.matmul %2, %1, %cst {dimension_numbers = #tpu.dot_dimension_numbers<[1], [0], [0], [1], [0, 0, 1, 1], [], []>} : vector<128x16xbf16>, vector<16x32xbf16>, vector<128x32xf32> -> vector<128x32xf32>
    %c0_3 = arith.constant 0 : index
    %c0_4 = arith.constant 0 : index
    %4 = vector.load %arg3[%c0_3, %c0_4] : memref<128x1xf32, #tpu.memory_space<vmem>>, vector<128x1xf32>
    %5 = vector.broadcast %4 : vector<128x1xf32> to vector<128x32xf32>
    %6 = arith.addf %3, %5 : vector<128x32xf32>
    %cst_5 = arith.constant 0.000000e+00 : f32
    %7 = vector.broadcast %cst_5 : f32 to vector<128x32xf32>
    %8 = arith.cmpf oge, %6, %7 : vector<128x32xf32>
    %cst_6 = arith.constant 1.000000e-01 : f32
    %9 = vector.broadcast %cst_6 : f32 to vector<128x32xf32>
    %10 = arith.mulf %9, %6 : vector<128x32xf32>
    %11 = arith.select %8, %6, %10 : vector<128x32xi1>, vector<128x32xf32>
    %c0_7 = arith.constant 0 : index
    %c0_8 = arith.constant 0 : index
    %c0_9 = arith.constant 0 : index
    %12 = vector.load %arg4[%c0_7, %c0_8, %c0_9] : memref<3x128x128xbf16, #tpu.memory_space<vmem>>, vector<1x128x128xbf16>
    %13 = vector.shape_cast %12 : vector<1x128x128xbf16> to vector<128x128xbf16>
    %14 = arith.truncf %11 : vector<128x32xf32> to vector<128x32xbf16>
    %cst_10 = arith.constant dense<0.000000e+00> : vector<128x32xf32>
    %15 = tpu.matmul %13, %14, %cst_10 {dimension_numbers = #tpu.dot_dimension_numbers<[1], [0], [0], [1], [0, 0, 1, 1], [], []>} : vector<128x128xbf16>, vector<128x32xbf16>, vector<128x32xf32> -> vector<128x32xf32>
    %c0_11 = arith.constant 0 : index
    %c0_12 = arith.constant 0 : index
    %c0_13 = arith.constant 0 : index
    %16 = vector.load %arg5[%c0_11, %c0_12, %c0_13] : memref<3x128x1xf32, #tpu.memory_space<vmem>>, vector<1x128x1xf32>
    %17 = vector.shape_cast %16 : vector<1x128x1xf32> to vector<128x1xf32>
    %18 = vector.broadcast %17 : vector<128x1xf32> to vector<128x32xf32>
    %19 = arith.addf %15, %18 : vector<128x32xf32>
    %cst_14 = arith.constant 0.000000e+00 : f32
    %20 = vector.broadcast %cst_14 : f32 to vector<128x32xf32>
    %21 = arith.cmpf oge, %19, %20 : vector<128x32xf32>
    %cst_15 = arith.constant 1.000000e-01 : f32
    %22 = vector.broadcast %cst_15 : f32 to vector<128x32xf32>
    %23 = arith.mulf %22, %19 : vector<128x32xf32>
    %24 = arith.select %21, %19, %23 : vector<128x32xi1>, vector<128x32xf32>
    %c0_16 = arith.constant 0 : index
    %c0_17 = arith.constant 0 : index
    %c0_18 = arith.constant 0 : index
    %25 = vector.load %arg6[%c0_16, %c0_17, %c0_18] : memref<3x128x128xbf16, #tpu.memory_space<vmem>>, vector<1x128x128xbf16>
    %26 = vector.shape_cast %25 : vector<1x128x128xbf16> to vector<128x128xbf16>
    %27 = arith.truncf %24 : vector<128x32xf32> to vector<128x32xbf16>
    %cst_19 = arith.constant dense<0.000000e+00> : vector<128x32xf32>
    %28 = tpu.matmul %26, %27, %cst_19 {dimension_numbers = #tpu.dot_dimension_numbers<[1], [0], [0], [1], [0, 0, 1, 1], [], []>} : vector<128x128xbf16>, vector<128x32xbf16>, vector<128x32xf32> -> vector<128x32xf32>
    %c0_20 = arith.constant 0 : index
    %c0_21 = arith.constant 0 : index
    %c0_22 = arith.constant 0 : index
    %29 = vector.load %arg7[%c0_20, %c0_21, %c0_22] : memref<3x128x1xf32, #tpu.memory_space<vmem>>, vector<1x128x1xf32>
    %30 = vector.shape_cast %29 : vector<1x128x1xf32> to vector<128x1xf32>
    %31 = vector.broadcast %30 : vector<128x1xf32> to vector<128x32xf32>
    %32 = arith.addf %28, %31 : vector<128x32xf32>
    %33 = arith.addf %32, %11 : vector<128x32xf32>
    %cst_23 = arith.constant 0.000000e+00 : f32
    %34 = vector.broadcast %cst_23 : f32 to vector<128x32xf32>
    %35 = arith.cmpf oge, %33, %34 : vector<128x32xf32>
    %cst_24 = arith.constant 1.000000e-01 : f32
    %36 = vector.broadcast %cst_24 : f32 to vector<128x32xf32>
    %37 = arith.mulf %36, %33 : vector<128x32xf32>
    %38 = arith.select %35, %33, %37 : vector<128x32xi1>, vector<128x32xf32>
    %c1 = arith.constant 1 : index
    %c0_25 = arith.constant 0 : index
    %c0_26 = arith.constant 0 : index
    %39 = vector.load %arg4[%c1, %c0_25, %c0_26] : memref<3x128x128xbf16, #tpu.memory_space<vmem>>, vector<1x128x128xbf16>
    %40 = vector.shape_cast %39 : vector<1x128x128xbf16> to vector<128x128xbf16>
    %41 = arith.truncf %38 : vector<128x32xf32> to vector<128x32xbf16>
    %cst_27 = arith.constant dense<0.000000e+00> : vector<128x32xf32>
    %42 = tpu.matmul %40, %41, %cst_27 {dimension_numbers = #tpu.dot_dimension_numbers<[1], [0], [0], [1], [0, 0, 1, 1], [], []>} : vector<128x128xbf16>, vector<128x32xbf16>, vector<128x32xf32> -> vector<128x32xf32>
    %c1_28 = arith.constant 1 : index
    %c0_29 = arith.constant 0 : index
    %c0_30 = arith.constant 0 : index
    %43 = vector.load %arg5[%c1_28, %c0_29, %c0_30] : memref<3x128x1xf32, #tpu.memory_space<vmem>>, vector<1x128x1xf32>
    %44 = vector.shape_cast %43 : vector<1x128x1xf32> to vector<128x1xf32>
    %45 = vector.broadcast %44 : vector<128x1xf32> to vector<128x32xf32>
    %46 = arith.addf %42, %45 : vector<128x32xf32>
    %cst_31 = arith.constant 0.000000e+00 : f32
    %47 = vector.broadcast %cst_31 : f32 to vector<128x32xf32>
    %48 = arith.cmpf oge, %46, %47 : vector<128x32xf32>
    %cst_32 = arith.constant 1.000000e-01 : f32
    %49 = vector.broadcast %cst_32 : f32 to vector<128x32xf32>
    %50 = arith.mulf %49, %46 : vector<128x32xf32>
    %51 = arith.select %48, %46, %50 : vector<128x32xi1>, vector<128x32xf32>
    %c1_33 = arith.constant 1 : index
    %c0_34 = arith.constant 0 : index
    %c0_35 = arith.constant 0 : index
    %52 = vector.load %arg6[%c1_33, %c0_34, %c0_35] : memref<3x128x128xbf16, #tpu.memory_space<vmem>>, vector<1x128x128xbf16>
    %53 = vector.shape_cast %52 : vector<1x128x128xbf16> to vector<128x128xbf16>
    %54 = arith.truncf %51 : vector<128x32xf32> to vector<128x32xbf16>
    %cst_36 = arith.constant dense<0.000000e+00> : vector<128x32xf32>
    %55 = tpu.matmul %53, %54, %cst_36 {dimension_numbers = #tpu.dot_dimension_numbers<[1], [0], [0], [1], [0, 0, 1, 1], [], []>} : vector<128x128xbf16>, vector<128x32xbf16>, vector<128x32xf32> -> vector<128x32xf32>
    %c1_37 = arith.constant 1 : index
    %c0_38 = arith.constant 0 : index
    %c0_39 = arith.constant 0 : index
    %56 = vector.load %arg7[%c1_37, %c0_38, %c0_39] : memref<3x128x1xf32, #tpu.memory_space<vmem>>, vector<1x128x1xf32>
    %57 = vector.shape_cast %56 : vector<1x128x1xf32> to vector<128x1xf32>
    %58 = vector.broadcast %57 : vector<128x1xf32> to vector<128x32xf32>
    %59 = arith.addf %55, %58 : vector<128x32xf32>
    %60 = arith.addf %59, %38 : vector<128x32xf32>
    %cst_40 = arith.constant 0.000000e+00 : f32
    %61 = vector.broadcast %cst_40 : f32 to vector<128x32xf32>
    %62 = arith.cmpf oge, %60, %61 : vector<128x32xf32>
    %cst_41 = arith.constant 1.000000e-01 : f32
    %63 = vector.broadcast %cst_41 : f32 to vector<128x32xf32>
    %64 = arith.mulf %63, %60 : vector<128x32xf32>
    %65 = arith.select %62, %60, %64 : vector<128x32xi1>, vector<128x32xf32>
    %c2 = arith.constant 2 : index
    %c0_42 = arith.constant 0 : index
    %c0_43 = arith.constant 0 : index
    %66 = vector.load %arg4[%c2, %c0_42, %c0_43] : memref<3x128x128xbf16, #tpu.memory_space<vmem>>, vector<1x128x128xbf16>
    %67 = vector.shape_cast %66 : vector<1x128x128xbf16> to vector<128x128xbf16>
    %68 = arith.truncf %65 : vector<128x32xf32> to vector<128x32xbf16>
    %cst_44 = arith.constant dense<0.000000e+00> : vector<128x32xf32>
    %69 = tpu.matmul %67, %68, %cst_44 {dimension_numbers = #tpu.dot_dimension_numbers<[1], [0], [0], [1], [0, 0, 1, 1], [], []>} : vector<128x128xbf16>, vector<128x32xbf16>, vector<128x32xf32> -> vector<128x32xf32>
    %c2_45 = arith.constant 2 : index
    %c0_46 = arith.constant 0 : index
    %c0_47 = arith.constant 0 : index
    %70 = vector.load %arg5[%c2_45, %c0_46, %c0_47] : memref<3x128x1xf32, #tpu.memory_space<vmem>>, vector<1x128x1xf32>
    %71 = vector.shape_cast %70 : vector<1x128x1xf32> to vector<128x1xf32>
    %72 = vector.broadcast %71 : vector<128x1xf32> to vector<128x32xf32>
    %73 = arith.addf %69, %72 : vector<128x32xf32>
    %cst_48 = arith.constant 0.000000e+00 : f32
    %74 = vector.broadcast %cst_48 : f32 to vector<128x32xf32>
    %75 = arith.cmpf oge, %73, %74 : vector<128x32xf32>
    %cst_49 = arith.constant 1.000000e-01 : f32
    %76 = vector.broadcast %cst_49 : f32 to vector<128x32xf32>
    %77 = arith.mulf %76, %73 : vector<128x32xf32>
    %78 = arith.select %75, %73, %77 : vector<128x32xi1>, vector<128x32xf32>
    %c2_50 = arith.constant 2 : index
    %c0_51 = arith.constant 0 : index
    %c0_52 = arith.constant 0 : index
    %79 = vector.load %arg6[%c2_50, %c0_51, %c0_52] : memref<3x128x128xbf16, #tpu.memory_space<vmem>>, vector<1x128x128xbf16>
    %80 = vector.shape_cast %79 : vector<1x128x128xbf16> to vector<128x128xbf16>
    %81 = arith.truncf %78 : vector<128x32xf32> to vector<128x32xbf16>
    %cst_53 = arith.constant dense<0.000000e+00> : vector<128x32xf32>
    %82 = tpu.matmul %80, %81, %cst_53 {dimension_numbers = #tpu.dot_dimension_numbers<[1], [0], [0], [1], [0, 0, 1, 1], [], []>} : vector<128x128xbf16>, vector<128x32xbf16>, vector<128x32xf32> -> vector<128x32xf32>
    %c2_54 = arith.constant 2 : index
    %c0_55 = arith.constant 0 : index
    %c0_56 = arith.constant 0 : index
    %83 = vector.load %arg7[%c2_54, %c0_55, %c0_56] : memref<3x128x1xf32, #tpu.memory_space<vmem>>, vector<1x128x1xf32>
    %84 = vector.shape_cast %83 : vector<1x128x1xf32> to vector<128x1xf32>
    %85 = vector.broadcast %84 : vector<128x1xf32> to vector<128x32xf32>
    %86 = arith.addf %82, %85 : vector<128x32xf32>
    %87 = arith.addf %86, %65 : vector<128x32xf32>
    %cst_57 = arith.constant 0.000000e+00 : f32
    %88 = vector.broadcast %cst_57 : f32 to vector<128x32xf32>
    %89 = arith.cmpf oge, %87, %88 : vector<128x32xf32>
    %cst_58 = arith.constant 1.000000e-01 : f32
    %90 = vector.broadcast %cst_58 : f32 to vector<128x32xf32>
    %91 = arith.mulf %90, %87 : vector<128x32xf32>
    %92 = arith.select %89, %87, %91 : vector<128x32xi1>, vector<128x32xf32>
    %c0_59 = arith.constant 0 : index
    %c0_60 = arith.constant 0 : index
    %93 = vector.load %arg8[%c0_59, %c0_60] : memref<16x128xbf16, #tpu.memory_space<vmem>>, vector<16x128xbf16>
    %94 = arith.truncf %92 : vector<128x32xf32> to vector<128x32xbf16>
    %cst_61 = arith.constant dense<0.000000e+00> : vector<16x32xf32>
    %95 = tpu.matmul %93, %94, %cst_61 {dimension_numbers = #tpu.dot_dimension_numbers<[1], [0], [0], [1], [0, 0, 1, 1], [], []>} : vector<16x128xbf16>, vector<128x32xbf16>, vector<16x32xf32> -> vector<16x32xf32>
    %c0_62 = arith.constant 0 : index
    %c0_63 = arith.constant 0 : index
    %96 = vector.load %arg9[%c0_62, %c0_63] : memref<16x1xf32, #tpu.memory_space<vmem>>, vector<16x1xf32>
    %97 = vector.broadcast %96 : vector<16x1xf32> to vector<16x32xf32>
    %98 = arith.addf %95, %97 : vector<16x32xf32>
    %cst_64 = arith.constant 0.000000e+00 : f32
    %99 = vector.broadcast %cst_64 : f32 to vector<16x32xf32>
    %100 = arith.maximumf %98, %99 : vector<16x32xf32>
    %c0_65 = arith.constant 0 : index
    %c0_66 = arith.constant 0 : index
    %101 = vector.load %arg10[%c0_65, %c0_66] : memref<16x32xf32, #tpu.memory_space<vmem>>, vector<16x32xf32>
    tpu.vector_store %arg10[%c0_65, %c0_66], %100 {strides = array<i32>} : memref<16x32xf32, #tpu.memory_space<vmem>>, vector<16x32xf32>,
    return
  }
  func.func @transform_0(%arg0: i32) -> (i32, i32) {
    %c0_i32 = arith.constant 0 : i32
    %c0_i32_0 = arith.constant 0 : i32
    return %c0_i32, %arg0 : i32, i32
  }
  func.func @transform_1(%arg0: i32) -> (i32, i32) {
    %c0_i32 = arith.constant 0 : i32
    %c0_i32_0 = arith.constant 0 : i32
    %c0_i32_1 = arith.constant 0 : i32
    return %c0_i32, %c0_i32_0 : i32, i32
  }
  func.func @transform_2(%arg0: i32) -> (i32, i32) {
    %c0_i32 = arith.constant 0 : i32
    %c0_i32_0 = arith.constant 0 : i32
    %c0_i32_1 = arith.constant 0 : i32
    return %c0_i32, %c0_i32_0 : i32, i32
  }
  func.func @transform_3(%arg0: i32) -> (i32, i32, i32) {
    %c0_i32 = arith.constant 0 : i32
    %c0_i32_0 = arith.constant 0 : i32
    %c0_i32_1 = arith.constant 0 : i32
    %c0_i32_2 = arith.constant 0 : i32
    return %c0_i32, %c0_i32_0, %c0_i32_1 : i32, i32, i32
  }
  func.func @transform_4(%arg0: i32) -> (i32, i32, i32) {
    %c0_i32 = arith.constant 0 : i32
    %c0_i32_0 = arith.constant 0 : i32
    %c0_i32_1 = arith.constant 0 : i32
    %c0_i32_2 = arith.constant 0 : i32
    return %c0_i32, %c0_i32_0, %c0_i32_1 : i32, i32, i32
  }
  func.func @transform_5(%arg0: i32) -> (i32, i32, i32) {
    %c0_i32 = arith.constant 0 : i32
    %c0_i32_0 = arith.constant 0 : i32
    %c0_i32_1 = arith.constant 0 : i32
    %c0_i32_2 = arith.constant 0 : i32
    return %c0_i32, %c0_i32_0, %c0_i32_1 : i32, i32, i32
  }
  func.func @transform_6(%arg0: i32) -> (i32, i32, i32) {
    %c0_i32 = arith.constant 0 : i32
    %c0_i32_0 = arith.constant 0 : i32
    %c0_i32_1 = arith.constant 0 : i32
    %c0_i32_2 = arith.constant 0 : i32
    return %c0_i32, %c0_i32_0, %c0_i32_1 : i32, i32, i32
  }
  func.func @transform_7(%arg0: i32) -> (i32, i32) {
    %c0_i32 = arith.constant 0 : i32
    %c0_i32_0 = arith.constant 0 : i32
    %c0_i32_1 = arith.constant 0 : i32
    return %c0_i32, %c0_i32_0 : i32, i32
  }
  func.func @transform_8(%arg0: i32) -> (i32, i32) {
    %c0_i32 = arith.constant 0 : i32
    %c0_i32_0 = arith.constant 0 : i32
    %c0_i32_1 = arith.constant 0 : i32
    return %c0_i32, %c0_i32_0 : i32, i32
  }
  func.func @transform_9(%arg0: i32) -> (i32, i32) {
    %c0_i32 = arith.constant 0 : i32
    %c0_i32_0 = arith.constant 0 : i32
    return %c0_i32, %arg0 : i32, i32
  }
}

</mosaic_0001>

<bundles_post_ra>
// kernel: tpu_custom_call.1
= control target key start
LH: loop header
LB: loop body
LE: loop exit
PB: predicated region body
PF: predicated region fallthrough
CT: control target
= control target key end

     0   :  { %v3009_v3 = vmov 0   ;;  %vm189_vm0 = vcmask 130048   ;;  %s3845_s0 = inlined_call_operand.vmem [shape: f32[16,32], index: 0, kind: input, shape index: {}]   ;;  %s3846_s1 = inlined_call_operand.vmem [shape: bf16[128,16], index: 1, kind: input, shape index: {}]   ;;  %s3847_s2 = inlined_call_operand.vmem [shape: f32[128,1], index: 2, kind: input, shape index: {}]   ;;  %s3848_s3 = inlined_call_operand.vmem [shape: bf16[3,128,128], index: 3, kind: input, shape index: {}]   ;;  %s3849_s4 = inlined_call_operand.vmem [shape: f32[3,128,1], index: 4, kind: input, shape index: {}]   ;;  %s3850_s5 = inlined_call_operand.vmem [shape: bf16[3,128,128], index: 5, kind: input, shape index: {}]   ;;  %s3851_s6 = inlined_call_operand.vmem [shape: f32[3,128,1], index: 6, kind: input, shape index: {}]   ;;  %s3852_s7 = inlined_call_operand.vmem [shape: bf16[16,128], index: 7, kind: input, shape index: {}]   ;;  %s3853_s8 = inlined_call_operand.vmem [shape: f32[16,1], index: 8, kind: input, shape index: {}]   ;;  %s3854_s9 = inlined_call_operand.hbm [shape: f32[16,32], index: 9, kind: output, shape index: {}]  }
   0x1   :  { %v55_v0 = vld [vmem:[%s3847_s2 + $0x10] sm:$0xff]  ;;  %v53_v1 = vld [vmem:[%s3847_s2] sm:$0xff]  ;;  %2927 = vset.pattern.permute.xlu1 %v3009_v3  ;;  %2926 = vset.pattern.permute.xlu0 %v3009_v3  ;;  %v35_v4 = vld [vmem:[%s3845_s0 + $0x8] sm:$0xff] }
   0x2   :  { %v34_v2 = vld [vmem:[%s3845_s0] sm:$0xff]  ;;  %v56_v5 = vld [vmem:[%s3847_s2 + $0x18] sm:$0xff]  ;;  %81 = vperm.xlu1 %2927, %v55_v0   ;;  %71 = vperm.xlu0 %2926, %v53_v1   ;;  %v54_v8 = vld [vmem:[%s3847_s2 + $0x8] sm:$0xff] }
   0x3   :  { %v36_v6 = vpack.c.bf16 %v35_v4, %v34_v2  ;;  %v2928_v7 = vld [vmem:[%s3846_s1] sm:$0xff]   ;;  %v2929_v9 = vld [vmem:[%s3846_s1 + $0x8] sm:$0xff]   ;;  %v2930_v10 = vld [vmem:[%s3846_s1 + $0x10] sm:$0xff]  }
   0x4   :  { %2692 = vmatprep.mubr.msk.bf16.mxu0 %vm189_vm0, %v2928_v7  ;;  %v58_v11 = vld [vmem:[%s3847_s2 + $0x28] sm:$0xff]  ;;  %v57_v12 = vld [vmem:[%s3847_s2 + $0x20] sm:$0xff]  ;;  %v60_v13 = vld [vmem:[%s3847_s2 + $0x38] sm:$0xff] }
   0x5   :  { %2690 = vmatprep.subr.bf16.mxu0 %v36_v6  ;;  %v59_v14 = vld [vmem:[%s3847_s2 + $0x30] sm:$0xff]  ;;  %v2931_v15 = vld [vmem:[%s3846_s1 + $0x18] sm:$0xff]   ;;  %v2932_v16 = vld [vmem:[%s3846_s1 + $0x20] sm:$0xff]  }
   0x6   :  { %2691 = vmatpush3.bf16.msra.mxu0 %v36_v6  ;;  %86 = vperm.xlu1 %2927, %v56_v5   ;;  %v62_v17 = vld [vmem:[%s3847_s2 + $0x48] sm:$0xff]  ;;  %v61_v18 = vld [vmem:[%s3847_s2 + $0x40] sm:$0xff]  ;;  %v64_v19 = vld [vmem:[%s3847_s2 + $0x58] sm:$0xff] }
   0x7   :  { %76 = vperm.xlu0 %2926, %v54_v8   ;;  %v63_v20 = vld [vmem:[%s3847_s2 + $0x50] sm:$0xff]  ;;  %v2933_v21 = vld [vmem:[%s3846_s1 + $0x28] sm:$0xff]   ;;  %v65_v24 = vld [vmem:[%s3847_s2 + $0x60] sm:$0xff] }
   0x8   :  { %v2934_v22 = vld [vmem:[%s3846_s1 + $0x30] sm:$0xff]   ;;  %v66_v23 = vld [vmem:[%s3847_s2 + $0x68] sm:$0xff]  ;;  %v68_v25 = vld [vmem:[%s3847_s2 + $0x78] sm:$0xff] }
   0x9   :  { %2693 = vmatmul.mubr.msk.bf16.vlgmr.msra.gmra.mrb[0].mxu0 %vm189_vm0, %v2929_v9  ;;  %v67_v26 = vld [vmem:[%s3847_s2 + $0x70] sm:$0xff]  ;;  %v2935_v27 = vld [vmem:[%s3846_s1 + $0x38] sm:$0xff]   ;;  %v384_v28 = vld [vmem:[%s3849_s4 + $0x8] sm:$0xff] }
   0xa   :  { %2696 = vmatprep.mubr.msk.bf16.mxu0 %vm189_vm0, %v2930_v10  ;;  %96 = vperm.xlu1 %2927, %v58_v11   ;;  %v383_v29 = vld [vmem:[%s3849_s4] sm:$0xff]  ;;  %v386_v30 = vld [vmem:[%s3849_s4 + $0x18] sm:$0xff]  ;;  %v385_v31 = vld [vmem:[%s3849_s4 + $0x10] sm:$0xff] }
   0xb   :  { %91 = vperm.xlu0 %2926, %v57_v12   ;;  %v388_v32 = vld [vmem:[%s3849_s4 + $0x28] sm:$0xff]  ;;  %v387_v33 = vld [vmem:[%s3849_s4 + $0x20] sm:$0xff]  ;;  %v390_v34 = vld [vmem:[%s3849_s4 + $0x38] sm:$0xff] }
   0xc   :  { %v389_v35 = vld [vmem:[%s3849_s4 + $0x30] sm:$0xff]  ;;  %v392_v36 = vld [vmem:[%s3849_s4 + $0x48] sm:$0xff]  ;;  %v391_v37 = vld [vmem:[%s3849_s4 + $0x40] sm:$0xff] }
   0xd   :  { %v394_v38 = vld [vmem:[%s3849_s4 + $0x58] sm:$0xff]  ;;  %v393_v39 = vld [vmem:[%s3849_s4 + $0x50] sm:$0xff]  ;;  %v396_v40 = vld [vmem:[%s3849_s4 + $0x68] sm:$0xff] }
   0xe   :  { %106 = vperm.xlu1 %2927, %v60_v13   ;;  %v395_v41 = vld [vmem:[%s3849_s4 + $0x60] sm:$0xff]  ;;  %v398_v42 = vld [vmem:[%s3849_s4 + $0x78] sm:$0xff]  ;;  %v397_v43 = vld [vmem:[%s3849_s4 + $0x70] sm:$0xff] }
   0xf   :  { %101 = vperm.xlu0 %2926, %v59_v14   ;;  %v697_v44 = vld [vmem:[%s3851_s6 + $0x8] sm:$0xff]  ;;  %v696_v45 = vld [vmem:[%s3851_s6] sm:$0xff]  ;;  %v699_v46 = vld [vmem:[%s3851_s6 + $0x18] sm:$0xff] }
  0x10   :  { %v698_v47 = vld [vmem:[%s3851_s6 + $0x10] sm:$0xff]  ;;  %v701_v48 = vld [vmem:[%s3851_s6 + $0x28] sm:$0xff]  ;;  %v700_v49 = vld [vmem:[%s3851_s6 + $0x20] sm:$0xff] }
  0x11   :  { %2697 = vmatmul.mubr.msk.bf16.gmra.mrb[4].mxu0 %vm189_vm0, %v2931_v15  ;;  %v703_v50 = vld [vmem:[%s3851_s6 + $0x38] sm:$0xff]  ;;  %v702_v51 = vld [vmem:[%s3851_s6 + $0x30] sm:$0xff] }
  0x12   :  { %2700 = vmatprep.mubr.msk.bf16.mxu0 %vm189_vm0, %v2932_v16  ;;  %116 = vperm.xlu1 %2927, %v62_v17  }
  0x13   :  { %111 = vperm.xlu0 %2926, %v61_v18  }
  0x16   :  { %126 = vperm.xlu1 %2927, %v64_v19  }
  0x17   :  { %121 = vperm.xlu0 %2926, %v63_v20  }
  0x19   :  { %2701 = vmatmul.mubr.msk.bf16.gmra.mrb[8].mxu0 %vm189_vm0, %v2933_v21 }
  0x1a   :  { %2704 = vmatprep.mubr.msk.bf16.mxu0 %vm189_vm0, %v2934_v22  ;;  %136 = vperm.xlu1 %2927, %v66_v23  }
  0x1b   :  { %131 = vperm.xlu0 %2926, %v65_v24  }
  0x1e   :  { %146 = vperm.xlu1 %2927, %v68_v25  }
  0x1f   :  { %141 = vperm.xlu0 %2926, %v67_v26  }
  0x21   :  { %2705 = vmatmul.mubr.msk.bf16.gmra.mrb[12].mxu0 %vm189_vm0, %v2935_v27 }
  0x22   :  { %406 = vperm.xlu1 %2927, %v384_v28  }
  0x23   :  { %401 = vperm.xlu0 %2926, %v383_v29  }
  0x26   :  { %416 = vperm.xlu1 %2927, %v386_v30  }
  0x27   :  { %411 = vperm.xlu0 %2926, %v385_v31  }
  0x2a   :  { %426 = vperm.xlu1 %2927, %v388_v32  }
  0x2b   :  { %421 = vperm.xlu0 %2926, %v387_v33  }
  0x2e   :  { %436 = vperm.xlu1 %2927, %v390_v34  }
  0x2f   :  { %431 = vperm.xlu0 %2926, %v389_v35  }
  0x32   :  { %446 = vperm.xlu1 %2927, %v392_v36  }
  0x33   :  { %441 = vperm.xlu0 %2926, %v391_v37  }
  0x36   :  { %456 = vperm.xlu1 %2927, %v394_v38  }
  0x37   :  { %451 = vperm.xlu0 %2926, %v393_v39  }
  0x3a   :  { %466 = vperm.xlu1 %2927, %v396_v40  }
  0x3b   :  { %461 = vperm.xlu0 %2926, %v395_v41  }
  0x3e   :  { %476 = vperm.xlu1 %2927, %v398_v42  }
  0x3f   :  { %471 = vperm.xlu0 %2926, %v397_v43  }
  0x42   :  { %719 = vperm.xlu1 %2927, %v697_v44  }
  0x43   :  { %714 = vperm.xlu0 %2926, %v696_v45  }
  0x46   :  { %729 = vperm.xlu1 %2927, %v699_v46  }
  0x47   :  { %724 = vperm.xlu0 %2926, %v698_v47  }
  0x4a   :  { %739 = vperm.xlu1 %2927, %v701_v48  }
  0x4b   :  { %734 = vperm.xlu0 %2926, %v700_v49  }
  0x4c   :  { %14 = vsyncpa [#allocation3], 0  ;;  %v705_v52 = vld [vmem:[%s3851_s6 + $0x48] sm:$0xff]  ;;  %v704_v53 = vld [vmem:[%s3851_s6 + $0x40] sm:$0xff]  ;;  %s3012_s29 = smov [#allocation2]  }
  0x4d   :  { %v707_v54 = vld [vmem:[%s3851_s6 + $0x58] sm:$0xff]  ;;  %v706_v55 = vld [vmem:[%s3851_s6 + $0x50] sm:$0xff]  ;;  %v709_v56 = vld [vmem:[%s3851_s6 + $0x68] sm:$0xff]  ;;  %s2372_s30 = sshll.u32 %s3012_s29, 4  ;;  %s2373_s30 = int_to_ptr.vmem [resolvable:$true] %s2372_s30 }
  0x4e   :  { %749 = vperm.xlu1 %2927, %v703_v50   ;;  %v708_v57 = vld [vmem:[%s3851_s6 + $0x60] sm:$0xff]  ;;  %v711_v58 = vld [vmem:[%s3851_s6 + $0x78] sm:$0xff]  ;;  %v710_v59 = vld [vmem:[%s3851_s6 + $0x70] sm:$0xff]  ;;  %s2985_s10 = scalar_lea.vmem %s2373_s30, 256  ;;  %p2990_p1 = scmp.lt.s32.totalorder %s2373_s30, %s2373_s30 }
  0x4f   :  { %744 = vperm.xlu0 %2926, %v702_v51   ;;  %v2432_v60 = vld [vmem:[%s3849_s4 + $0x88] sm:$0xff]  ;;  %v2431_v61 = vld [vmem:[%s3849_s4 + $0x80] sm:$0xff]  ;;  %v2434_v62 = vld [vmem:[%s3849_s4 + $0x98] sm:$0xff]  ;;  %p2986_p0 = scmp.ne.s32.totalorder %s2373_s30, %s2985_s10  ;;  %p2991_p2 = scmp.lt.s32.totalorder %s2985_s10, %s2985_s10 }
  0x50   :  { %v2433_v63 = vld [vmem:[%s3849_s4 + $0x90] sm:$0xff]  ;;  %v2436_v0 = vld [vmem:[%s3849_s4 + $0xa8] sm:$0xff]  ;;  %v2435_v1 = vld [vmem:[%s3849_s4 + $0xa0] sm:$0xff] }
  0x51   :  { %v2438_v2 = vld [vmem:[%s3849_s4 + $0xb8] sm:$0xff]  ;;  %v2437_v3 = vld [vmem:[%s3849_s4 + $0xb0] sm:$0xff]  ;;  %v2440_v4 = vld [vmem:[%s3849_s4 + $0xc8] sm:$0xff]  ;;  %p2992_p3 = por %p2991_p2, %p2990_p1 }
  0x52   :  { %759 = vperm.xlu1 %2927, %v705_v52   ;;  %v2439_v5 = vld [vmem:[%s3849_s4 + $0xc0] sm:$0xff]  ;;  %v2442_v6 = vld [vmem:[%s3849_s4 + $0xd8] sm:$0xff]  ;;  %v2441_v7 = vld [vmem:[%s3849_s4 + $0xd0] sm:$0xff] }
  0x53   :  { %754 = vperm.xlu0 %2926, %v704_v53   ;;  %v2444_v8 = vld [vmem:[%s3849_s4 + $0xe8] sm:$0xff]  ;;  %v2443_v9 = vld [vmem:[%s3849_s4 + $0xe0] sm:$0xff]  ;;  %v2446_v10 = vld [vmem:[%s3849_s4 + $0xf8] sm:$0xff]  ;;  %p2993_p4 = pnand %p2992_p3, %p2986_p0 }
  0x54   :  { %v2445_v11 = vld [vmem:[%s3849_s4 + $0xf0] sm:$0xff]  ;;  %v2472_v12 = vld [vmem:[%s3851_s6 + $0x88] sm:$0xff]  ;;  %v2471_v13 = vld [vmem:[%s3851_s6 + $0x80] sm:$0xff] }
  0x55   :  { %v2474_v14 = vld [vmem:[%s3851_s6 + $0x98] sm:$0xff]  ;;  %v2473_v15 = vld [vmem:[%s3851_s6 + $0x90] sm:$0xff]  ;;  %v2936_v16 = vld [vmem:[%s3848_s3] sm:$0xff]  }
  0x56   :  { %769 = vperm.xlu1 %2927, %v707_v54   ;;  %2724 = vmatprep.mubr.bf16.mxu1 %v2936_v16  ;;  %v2476_v17 = vld [vmem:[%s3851_s6 + $0xa8] sm:$0xff]  ;;  %v2475_v18 = vld [vmem:[%s3851_s6 + $0xa0] sm:$0xff]  ;;  %v2478_v19 = vld [vmem:[%s3851_s6 + $0xb8] sm:$0xff] }
  0x57   :  { %764 = vperm.xlu0 %2926, %v706_v55   ;;  %v2477_v20 = vld [vmem:[%s3851_s6 + $0xb0] sm:$0xff]  ;;  %v2480_v21 = vld [vmem:[%s3851_s6 + $0xc8] sm:$0xff]  ;;  %v2479_v22 = vld [vmem:[%s3851_s6 + $0xc0] sm:$0xff] }
  0x58   :  { %v2482_v23 = vld [vmem:[%s3851_s6 + $0xd8] sm:$0xff]  ;;  %v2481_v24 = vld [vmem:[%s3851_s6 + $0xd0] sm:$0xff]  ;;  %v2484_v25 = vld [vmem:[%s3851_s6 + $0xe8] sm:$0xff] }
  0x59   :  { %v2483_v26 = vld [vmem:[%s3851_s6 + $0xe0] sm:$0xff]  ;;  %v2486_v27 = vld [vmem:[%s3851_s6 + $0xf8] sm:$0xff]  ;;  %v2485_v28 = vld [vmem:[%s3851_s6 + $0xf0] sm:$0xff] }
  0x5a   :  { %779 = vperm.xlu1 %2927, %v709_v56   ;;  %v2512_v29 = vld [vmem:[%s3849_s4 + $0x108] sm:$0xff]  ;;  %v2511_v30 = vld [vmem:[%s3849_s4 + $0x100] sm:$0xff]  ;;  %v2514_v31 = vld [vmem:[%s3849_s4 + $0x118] sm:$0xff] }
  0x5b   :  { %774 = vperm.xlu0 %2926, %v708_v57   ;;  %v2513_v32 = vld [vmem:[%s3849_s4 + $0x110] sm:$0xff]  ;;  %v2516_v33 = vld [vmem:[%s3849_s4 + $0x128] sm:$0xff]  ;;  %v2515_v34 = vld [vmem:[%s3849_s4 + $0x120] sm:$0xff] }
  0x5c   :  { %v2518_v35 = vld [vmem:[%s3849_s4 + $0x138] sm:$0xff]  ;;  %v2517_v36 = vld [vmem:[%s3849_s4 + $0x130] sm:$0xff]  ;;  %v2520_v37 = vld [vmem:[%s3849_s4 + $0x148] sm:$0xff] }
  0x5d   :  { %v2519_v38 = vld [vmem:[%s3849_s4 + $0x140] sm:$0xff]  ;;  %v2522_v39 = vld [vmem:[%s3849_s4 + $0x158] sm:$0xff]  ;;  %v2521_v40 = vld [vmem:[%s3849_s4 + $0x150] sm:$0xff] }
  0x5e   :  { %789 = vperm.xlu1 %2927, %v711_v58   ;;  %v2524_v42 = vld [vmem:[%s3849_s4 + $0x168] sm:$0xff]  ;;  %v2523_v43 = vld [vmem:[%s3849_s4 + $0x160] sm:$0xff]  ;;  %v2526_v45 = vld [vmem:[%s3849_s4 + $0x178] sm:$0xff] }
  0x5f   :  { %784 = vperm.xlu0 %2926, %v710_v59   ;;  %v2525_v46 = vld [vmem:[%s3849_s4 + $0x170] sm:$0xff]  ;;  %v2552_v49 = vld [vmem:[%s3851_s6 + $0x108] sm:$0xff]  ;;  %v2551_v50 = vld [vmem:[%s3851_s6 + $0x100] sm:$0xff] }
  0x60   :  { %v2554_v52 = vld [vmem:[%s3851_s6 + $0x118] sm:$0xff]  ;;  %v2553_v53 = vld [vmem:[%s3851_s6 + $0x110] sm:$0xff]  ;;  %v2556_v55 = vld [vmem:[%s3851_s6 + $0x128] sm:$0xff] }
  0x61   :  { %v2555_v56 = vld [vmem:[%s3851_s6 + $0x120] sm:$0xff]  ;;  %v2558_v59 = vld [vmem:[%s3851_s6 + $0x138] sm:$0xff] }
  0x62   :  { %1050 = vperm.xlu1 %2927, %v2432_v60   ;;  %v2557_v60 = vld [vmem:[%s3851_s6 + $0x130] sm:$0xff] }
  0x63   :  { %1045 = vperm.xlu0 %2926, %v2431_v61  }
  0x66   :  { %1060 = vperm.xlu1 %2927, %v2434_v62   ;;  %v2560_v62 = vld [vmem:[%s3851_s6 + $0x148] sm:$0xff] }
  0x67   :  { %1055 = vperm.xlu0 %2926, %v2433_v63   ;;  %v2559_v63 = vld [vmem:[%s3851_s6 + $0x140] sm:$0xff] }
  0x6a   :  { %1070 = vperm.xlu1 %2927, %v2436_v0  }
  0x6b   :  { %1065 = vperm.xlu0 %2926, %v2435_v1   ;;  %v2562_v1 = vld [vmem:[%s3851_s6 + $0x158] sm:$0xff] }
  0x6e   :  { %1080 = vperm.xlu1 %2927, %v2438_v2   ;;  %v2561_v2 = vld [vmem:[%s3851_s6 + $0x150] sm:$0xff] }
  0x6f   :  { %1075 = vperm.xlu0 %2926, %v2437_v3  }
  0x72   :  { %1090 = vperm.xlu1 %2927, %v2440_v4  }
  0x73   :  { %1085 = vperm.xlu0 %2926, %v2439_v5   ;;  %v2564_v5 = vld [vmem:[%s3851_s6 + $0x168] sm:$0xff] }
  0x76   :  { %1100 = vperm.xlu1 %2927, %v2442_v6   ;;  %v2563_v6 = vld [vmem:[%s3851_s6 + $0x160] sm:$0xff] }
  0x77   :  { %1095 = vperm.xlu0 %2926, %v2441_v7  }
  0x7a   :  { %1110 = vperm.xlu1 %2927, %v2444_v8  }
  0x7b   :  { %1105 = vperm.xlu0 %2926, %v2443_v9   ;;  %v2566_v9 = vld [vmem:[%s3851_s6 + $0x178] sm:$0xff] }
  0x7e   :  { %1120 = vperm.xlu1 %2927, %v2446_v10   ;;  %v2565_v10 = vld [vmem:[%s3851_s6 + $0x170] sm:$0xff] }
  0x7f   :  { %1115 = vperm.xlu0 %2926, %v2445_v11  }
  0x81   :  { %v82_v41 = vpop.permute.xlu1 %81  ;;  %v72_v44 = vpop.permute.xlu0 %71 }
  0x82   :  { %1365 = vperm.xlu1 %2927, %v2472_v12  }
  0x83   :  { %1360 = vperm.xlu0 %2926, %v2471_v13  }
  0x85   :  { %v87_v47 = vpop.permute.xlu1 %86 }
  0x86   :  { %1375 = vperm.xlu1 %2927, %v2474_v14   ;;  %v77_v48 = vpop.permute.xlu0 %76 }
  0x87   :  { %1370 = vperm.xlu0 %2926, %v2473_v15  }
  0x89   :  { %v3400_v51 = vpop.permute.xlu1 %96 }
  0x8a   :  { %1385 = vperm.xlu1 %2927, %v2476_v17   ;;  %v3408_v54 = vpop.permute.xlu0 %91 }
  0x8b   :  { %1380 = vperm.xlu0 %2926, %v2475_v18  }
  0x8d   :  { %v3416_v57 = vpop.permute.xlu1 %106 }
  0x8e   :  { %1395 = vperm.xlu1 %2927, %v2478_v19   ;;  %v102_v58 = vpop.permute.xlu0 %101 }
  0x8f   :  { %1390 = vperm.xlu0 %2926, %v2477_v20   ;;  %v2304_v20 = vld [vmem:[%s3853_s8 + $0x8] sm:$0xff] }
  0x91   :  { %v3424_v61 = vpop.permute.xlu1 %116 }
  0x92   :  { %1405 = vperm.xlu1 %2927, %v2480_v21   ;;  %v3432_v0 = vpop.permute.xlu0 %111  ;;  %v2303_v21 = vld [vmem:[%s3853_s8] sm:$0xff] }
  0x93   :  { %1400 = vperm.xlu0 %2926, %v2479_v22  }
  0x95   :  { %v3440_v3 = vpop.permute.xlu1 %126 }
  0x96   :  { %1415 = vperm.xlu1 %2927, %v2482_v23   ;;  %v3442_v4 = vpop.permute.xlu0 %121 }
  0x97   :  { %1410 = vperm.xlu0 %2926, %v2481_v24  }
  0x99   :  { %v3450_v7 = vpop.permute.xlu1 %136 }
  0x9a   :  { %1425 = vperm.xlu1 %2927, %v2484_v25   ;;  %v3458_v11 = vpop.permute.xlu0 %131 }
  0x9b   :  { %1420 = vperm.xlu0 %2926, %v2483_v26  }
  0x9d   :  { %v3466_v25 = vpop.permute.xlu1 %146 }
  0x9e   :  { %1435 = vperm.xlu1 %2927, %v2486_v27   ;;  %v142_v26 = vpop.permute.xlu0 %141 }
  0x9f   :  { %1430 = vperm.xlu0 %2926, %v2485_v28  }
  0xa2   :  { %1696 = vperm.xlu1 %2927, %v2512_v29  }
  0xa3   :  { %1691 = vperm.xlu0 %2926, %v2511_v30  }
  0xa6   :  { %1706 = vperm.xlu1 %2927, %v2514_v31  }
  0xa7   :  { %1701 = vperm.xlu0 %2926, %v2513_v32  }
  0xaa   :  { %1716 = vperm.xlu1 %2927, %v2516_v33  }
  0xab   :  { %1711 = vperm.xlu0 %2926, %v2515_v34  }
  0xae   :  { %1726 = vperm.xlu1 %2927, %v2518_v35  }
  0xaf   :  { %1721 = vperm.xlu0 %2926, %v2517_v36  }
  0xb2   :  { %1736 = vperm.xlu1 %2927, %v2520_v37  }
  0xb3   :  { %1731 = vperm.xlu0 %2926, %v2519_v38  }
  0xb6   :  { %1746 = vperm.xlu1 %2927, %v2522_v39  }
  0xb7   :  { %1741 = vperm.xlu0 %2926, %v2521_v40  }
  0xba   :  { %1756 = vperm.xlu1 %2927, %v2524_v42  }
  0xbb   :  { %1751 = vperm.xlu0 %2926, %v2523_v43  }
  0xbe   :  { %1766 = vperm.xlu1 %2927, %v2526_v45  }
  0xbf   :  { %1761 = vperm.xlu0 %2926, %v2525_v46  }
  0xc2   :  { %2011 = vperm.xlu1 %2927, %v2552_v49  }
  0xc3   :  { %2006 = vperm.xlu0 %2926, %v2551_v50  }
  0xc6   :  { %2021 = vperm.xlu1 %2927, %v2554_v52  }
  0xc7   :  { %2016 = vperm.xlu0 %2926, %v2553_v53  }
  0xca   :  { %2031 = vperm.xlu1 %2927, %v2556_v55  }
  0xcb   :  { %2026 = vperm.xlu0 %2926, %v2555_v56  }
  0xce   :  { %2041 = vperm.xlu1 %2927, %v2558_v59  }
  0xcf   :  { %2036 = vperm.xlu0 %2926, %v2557_v60  }
  0xd2   :  { %2051 = vperm.xlu1 %2927, %v2560_v62  }
  0xd3   :  { %2046 = vperm.xlu0 %2926, %v2559_v63  }
  0xd6   :  { %2061 = vperm.xlu1 %2927, %v2562_v1  }
  0xd7   :  { %2056 = vperm.xlu0 %2926, %v2561_v2  }
  0xda   :  { %2071 = vperm.xlu1 %2927, %v2564_v5  }
  0xdb   :  { %2066 = vperm.xlu0 %2926, %v2563_v6  }
  0xdc   :  { %v2694_v8 = vpop.f32.mrb[0].mxu0 }
  0xdd   :  { %v248_v12 = vpop.f32.mrb[1].mxu0  ;;  %v257_v13 = vadd.f32 %v2694_v8, %v82_v41 }
  0xde   :  { %v249_v14 = vadd.f32 %v248_v12, %v72_v44  ;;  %v2695_v15 = vpop.f32.mrb[2].mxu0  ;;  %2081 = vperm.xlu1 %2927, %v2566_v9  }
  0xdf   :  { %v260_v16 = vadd.f32 %v2695_v15, %v87_v47  ;;  %v251_v17 = vpop.f32.mrb[3].mxu0  ;;  %2076 = vperm.xlu0 %2926, %v2565_v10   ;;  %v329_v23 = vmul.f32 0.1, %v257_v13  ;;  %vm313_vm4 = vcmp.ge.f32.partialorder %v257_v13, 0.0 }
  0xe0   :  { %v327_v18 = vmul.f32 0.1, %v249_v14  ;;  %v252_v19 = vadd.f32 %v251_v17, %v77_v48  ;;  %vm311_vm2 = vcmp.ge.f32.partialorder %v249_v14, 0.0 }
  0xe1   :  { %vm314_vm1 = vcmp.ge.f32.partialorder %v260_v16, 0.0  ;;  %v330_v22 = vmul.f32 0.1, %v260_v16  ;;  %v3477_v36 = vsel %vm313_vm4, %v257_v13, %v329_v23  ;;  %v2937_v23 = vld [vmem:[%s3848_s3 + $0x8] sm:$0xff]  }
  0xe2   :  { %v328_v24 = vmul.f32 0.1, %v252_v19  ;;  %vm312_vm3 = vcmp.ge.f32.partialorder %v252_v19, 0.0  ;;  %2312 = vperm.xlu1 %2927, %v2304_v20   ;;  %v3468_v28 = vsel %vm311_vm2, %v249_v14, %v327_v18 }
  0xe3   :  { %2307 = vperm.xlu0 %2926, %v2303_v21   ;;  %v3472_v30 = vsel %vm314_vm1, %v260_v16, %v330_v22 }
  0xe4   :  { %v2698_v27 = vpop.f32.mrb[4].mxu0  ;;  %v3470_v29 = vsel %vm312_vm3, %v252_v19, %v328_v24  ;;  %v376_v39 = vpack.c.bf16 %v3472_v30, %v3477_v36  ;;  %v2938_v24 = vld [vmem:[%s3848_s3 + $0x10] sm:$0xff]  }
  0xe5   :  { %v264_v31 = vpop.f32.mrb[5].mxu0  ;;  %v375_v32 = vpack.c.bf16 %v3470_v29, %v3468_v28  ;;  %v273_v33 = vadd.f32 %v2698_v27, %v102_v58  ;;  %v2941_v27 = vld [vmem:[%s3848_s3 + $0x28] sm:$0xff]  }
  0xe6   :  { %v265_v34 = vadd.f32 %v264_v31, %v3408_v54  ;;  %v2699_v35 = vpop.f32.mrb[6].mxu0  ;;  %v2942_v31 = vld [vmem:[%s3848_s3 + $0x30] sm:$0xff]  }
  0xe7   :  { %v276_v37 = vadd.f32 %v2699_v35, %v3416_v57  ;;  %v267_v38 = vpop.f32.mrb[7].mxu0  ;;  %2708 = vmatprep.subr.bf16.mxu1 %v375_v32  ;;  %v333_v43 = vmul.f32 0.1, %v273_v33  ;;  %vm317_vm8 = vcmp.ge.f32.partialorder %v273_v33, 0.0  ;;  %v407_v35 = vpop.permute.xlu1 %406 }
  0xe8   :  { %v331_v40 = vmul.f32 0.1, %v265_v34  ;;  %v268_v41 = vadd.f32 %v267_v38, %v3400_v51  ;;  %2709 = vmatpush3.bf16.msra.mxu1 %v375_v32  ;;  %vm315_vm5 = vcmp.ge.f32.partialorder %v265_v34, 0.0  ;;  %v2943_v32 = vld [vmem:[%s3848_s3 + $0x38] sm:$0xff]  }
  0xe9   :  { %vm318_vm6 = vcmp.ge.f32.partialorder %v276_v37, 0.0  ;;  %v334_v42 = vmul.f32 0.1, %v276_v37  ;;  %2710 = vmatprep.subr.bf16.mxu1 %v376_v39  ;;  %v3493_v54 = vsel %vm317_vm8, %v273_v33, %v333_v43  ;;  %v2944_v33 = vld [vmem:[%s3850_s5] sm:$0xff]  }
  0xea   :  { %vm316_vm7 = vcmp.ge.f32.partialorder %v268_v41, 0.0  ;;  %v332_v44 = vmul.f32 0.1, %v268_v41  ;;  %v3483_v46 = vsel %vm315_vm5, %v265_v34, %v331_v40  ;;  %2756 = vmatprep.mubr.bf16.mxu0 %v2944_v33  ;;  %v402_v34 = vpop.permute.xlu0 %401 }
  0xeb   :  { %v3487_v48 = vsel %vm318_vm6, %v276_v37, %v334_v42  ;;  %v417_v38 = vpop.permute.xlu1 %416 }
  0xec   :  { %v2702_v45 = vpop.f32.mrb[8].mxu0  ;;  %2711 = vmatpush3.bf16.msra.mxu1 %v376_v39  ;;  %v3485_v47 = vsel %vm316_vm7, %v268_v41, %v332_v44  ;;  %v378_v57 = vpack.c.bf16 %v3487_v48, %v3493_v54 }
  0xed   :  { %v280_v49 = vpop.f32.mrb[9].mxu0  ;;  %v377_v50 = vpack.c.bf16 %v3485_v47, %v3483_v46  ;;  %v289_v51 = vadd.f32 %v2702_v45, %v3442_v4 }
  0xee   :  { %v281_v52 = vadd.f32 %v280_v49, %v3432_v0  ;;  %v2703_v53 = vpop.f32.mrb[10].mxu0  ;;  %v412_v37 = vpop.permute.xlu0 %411 }
  0xef   :  { %v292_v55 = vadd.f32 %v2703_v53, %v3440_v3  ;;  %v283_v56 = vpop.f32.mrb[11].mxu0  ;;  %2712 = vmatprep.subr.bf16.mxu1 %v377_v50  ;;  %v337_v62 = vmul.f32 0.1, %v289_v51  ;;  %vm321_vm12 = vcmp.ge.f32.partialorder %v289_v51, 0.0  ;;  %v427_v40 = vpop.permute.xlu1 %426 }
  0xf0   :  { %v335_v58 = vmul.f32 0.1, %v281_v52  ;;  %v284_v59 = vadd.f32 %v283_v56, %v3424_v61  ;;  %2713 = vmatpush3.bf16.msra.mxu1 %v377_v50  ;;  %vm319_vm9 = vcmp.ge.f32.partialorder %v281_v52, 0.0 }
  0xf1   :  { %vm322_vm10 = vcmp.ge.f32.partialorder %v292_v55, 0.0  ;;  %v338_v60 = vmul.f32 0.1, %v292_v55  ;;  %2714 = vmatprep.subr.bf16.mxu1 %v378_v57  ;;  %v3508_v9 = vsel %vm321_vm12, %v289_v51, %v337_v62 }
  0xf2   :  { %vm320_vm11 = vcmp.ge.f32.partialorder %v284_v59, 0.0  ;;  %v336_v63 = vmul.f32 0.1, %v284_v59  ;;  %v3499_v1 = vsel %vm319_vm9, %v281_v52, %v335_v58  ;;  %v422_v39 = vpop.permute.xlu0 %421 }
  0xf3   :  { %v3503_v3 = vsel %vm322_vm10, %v292_v55, %v338_v60  ;;  %v437_v45 = vpop.permute.xlu1 %436 }
  0xf4   :  { %v2706_v0 = vpop.f32.mrb[12].mxu0  ;;  %2715 = vmatpush3.bf16.msra.mxu1 %v378_v57  ;;  %v3501_v2 = vsel %vm320_vm11, %v284_v59, %v336_v63  ;;  %v380_v13 = vpack.c.bf16 %v3503_v3, %v3508_v9 }
  0xf5   :  { %v296_v4 = vpop.f32.mrb[13].mxu0  ;;  %v379_v61 = vpack.c.bf16 %v3501_v2, %v3499_v1  ;;  %v305_v5 = vadd.f32 %v2706_v0, %v142_v26  ;;  %v2940_v26 = vld [vmem:[%s3848_s3 + $0x20] sm:$0xff]  }
  0xf6   :  { %v297_v6 = vadd.f32 %v296_v4, %v3458_v11  ;;  %v2707_v8 = vpop.f32.mrb[14].mxu0  ;;  %v432_v41 = vpop.permute.xlu0 %431 }
  0xf7   :  { %v308_v10 = vadd.f32 %v2707_v8, %v3466_v25  ;;  %v299_v12 = vpop.f32.mrb[15].mxu0  ;;  %2716 = vmatprep.subr.bf16.mxu1 %v379_v61  ;;  %v341_v17 = vmul.f32 0.1, %v305_v5  ;;  %vm325_vm0 = vcmp.ge.f32.partialorder %v305_v5, 0.0  ;;  %v2939_v25 = vld [vmem:[%s3848_s3 + $0x18] sm:$0xff]   ;;  %v447_v63 = vpop.permute.xlu1 %446 }
  0xf8   :  { %v339_v14 = vmul.f32 0.1, %v297_v6  ;;  %v300_v15 = vadd.f32 %v299_v12, %v3450_v7  ;;  %2717 = vmatpush3.bf16.msra.mxu1 %v379_v61  ;;  %vm323_vm13 = vcmp.ge.f32.partialorder %v297_v6, 0.0 }
  0xf9   :  { %vm326_vm14 = vcmp.ge.f32.partialorder %v308_v10, 0.0  ;;  %v342_v16 = vmul.f32 0.1, %v308_v10  ;;  %2718 = vmatprep.subr.bf16.mxu1 %v380_v13  ;;  %v3522_v7 = vsel %vm325_vm0, %v305_v5, %v341_v17 }
  0xfa   :  { %vm324_vm15 = vcmp.ge.f32.partialorder %v300_v15, 0.0  ;;  %v340_v11 = vmul.f32 0.1, %v300_v15  ;;  %v3514_v18 = vsel %vm323_vm13, %v297_v6, %v339_v14  ;;  %v442_v58 = vpop.permute.xlu0 %441 }
  0xfb   :  { %v3518_v20 = vsel %vm326_vm14, %v308_v10, %v342_v16 }
  0xfc   :  { %2719 = vmatpush3.bf16.msra.mxu1 %v380_v13  ;;  %v3516_v19 = vsel %vm324_vm15, %v300_v15, %v340_v11  ;;  %v382_v22 = vpack.c.bf16 %v3518_v20, %v3522_v7 }
  0xfd   :  { %v381_v21 = vpack.c.bf16 %v3516_v19, %v3514_v18 }
  0xfe   :  { %v452_v17 = vpop.permute.xlu0 %451 }
  0xff   :  { %2720 = vmatprep.subr.bf16.mxu1 %v381_v21 }
 0x100   :  { %2721 = vmatpush3.bf16.msra.mxu1 %v381_v21 }
 0x101   :  { %2722 = vmatprep.subr.bf16.mxu1 %v382_v22 }
 0x104   :  { %2723 = vmatpush3.bf16.msra.mxu1 %v382_v22 }
 0x107   :  { %2725 = vmatmul.mubr.bf16.vlgmr.msra.gmra.mrb[0].mxu1 %v2937_v23  ;;  %v457_v23 = vpop.permute.xlu1 %456 }
 0x108   :  { %2728 = vmatprep.mubr.bf16.mxu1 %v2938_v24 }
 0x10f   :  { %2729 = vmatmul.mubr.bf16.gmra.mrb[4].mxu1 %v2939_v25 }
 0x110   :  { %2732 = vmatprep.mubr.bf16.mxu1 %v2940_v26 }
 0x117   :  { %2733 = vmatmul.mubr.bf16.gmra.mrb[8].mxu1 %v2941_v27 }
 0x118   :  { %2736 = vmatprep.mubr.bf16.mxu1 %v2942_v31 }
 0x11f   :  { %2737 = vmatmul.mubr.bf16.gmra.mrb[12].mxu1 %v2943_v32 }
 0x1da   :  { %v2726_v42 = vpop.f32.mrb[0].mxu1 }
 0x1db   :  { %v570_v43 = vadd.f32 %v2726_v42, %v412_v37  ;;  %v561_v44 = vpop.f32.mrb[1].mxu1 }
 0x1dc   :  { %v562_v49 = vadd.f32 %v561_v44, %v402_v34  ;;  %v2727_v50 = vpop.f32.mrb[2].mxu1  ;;  %v467_v44 = vpop.permute.xlu1 %466 }
 0x1dd   :  { %v642_v51 = vmul.f32 0.1, %v570_v43  ;;  %v573_v52 = vadd.f32 %v2727_v50, %v417_v38  ;;  %v564_v53 = vpop.f32.mrb[3].mxu1  ;;  %vm626_vm1 = vcmp.ge.f32.partialorder %v570_v43, 0.0  ;;  %v462_v38 = vpop.permute.xlu0 %461 }
 0x1de   :  { %v640_v55 = vmul.f32 0.1, %v562_v49  ;;  %v565_v56 = vadd.f32 %v564_v53, %v407_v35  ;;  %vm624_vm2 = vcmp.ge.f32.partialorder %v562_v49, 0.0 }
 0x1df   :  { %vm627_vm3 = vcmp.ge.f32.partialorder %v573_v52, 0.0  ;;  %v643_v57 = vmul.f32 0.1, %v573_v52  ;;  %v658_v60 = vsel %vm626_vm1, %v570_v43, %v642_v51 }
 0x1e0   :  { %vm625_vm4 = vcmp.ge.f32.partialorder %v565_v56, 0.0  ;;  %v641_v59 = vmul.f32 0.1, %v565_v56  ;;  %v656_v4 = vsel %vm624_vm2, %v562_v49, %v640_v55 }
 0x1e1   :  { %v659_v62 = vsel %vm627_vm3, %v573_v52, %v643_v57  ;;  %v472_v55 = vpop.permute.xlu0 %471 }
 0x1e2   :  { %v2730_v0 = vpop.f32.mrb[4].mxu1  ;;  %v657_v61 = vsel %vm625_vm4, %v565_v56, %v641_v59  ;;  %v689_v5 = vpack.c.bf16 %v659_v62, %v658_v60 }
 0x1e3   :  { %v586_v6 = vadd.f32 %v2730_v0, %v432_v41  ;;  %v577_v8 = vpop.f32.mrb[5].mxu1  ;;  %v688_v10 = vpack.c.bf16 %v657_v61, %v656_v4  ;;  %v477_v4 = vpop.permute.xlu1 %476 }
 0x1e4   :  { %v578_v12 = vadd.f32 %v577_v8, %v422_v39  ;;  %v2731_v13 = vpop.f32.mrb[6].mxu1 }
 0x1e5   :  { %v646_v14 = vmul.f32 0.1, %v586_v6  ;;  %v589_v15 = vadd.f32 %v2731_v13, %v437_v45  ;;  %v580_v16 = vpop.f32.mrb[7].mxu1  ;;  %2740 = vmatprep.subr.bf16.mxu0 %v688_v10  ;;  %vm630_vm5 = vcmp.ge.f32.partialorder %v586_v6, 0.0 }
 0x1e6   :  { %v644_v11 = vmul.f32 0.1, %v578_v12  ;;  %v581_v21 = vadd.f32 %v580_v16, %v427_v40  ;;  %2741 = vmatpush3.bf16.msra.mxu0 %v688_v10  ;;  %vm628_vm6 = vcmp.ge.f32.partialorder %v578_v12, 0.0 }
 0x1e7   :  { %vm631_vm7 = vcmp.ge.f32.partialorder %v589_v15, 0.0  ;;  %v647_v22 = vmul.f32 0.1, %v589_v15  ;;  %2742 = vmatprep.subr.bf16.mxu0 %v689_v5  ;;  %v662_v25 = vsel %vm630_vm5, %v586_v6, %v646_v14 }
 0x1e8   :  { %vm629_vm8 = vcmp.ge.f32.partialorder %v581_v21, 0.0  ;;  %v645_v24 = vmul.f32 0.1, %v581_v21  ;;  %v660_v31 = vsel %vm628_vm6, %v578_v12, %v644_v11 }
 0x1e9   :  { %v663_v26 = vsel %vm631_vm7, %v589_v15, %v647_v22 }
 0x1ea   :  { %v2734_v27 = vpop.f32.mrb[8].mxu1  ;;  %2743 = vmatpush3.bf16.msra.mxu0 %v689_v5  ;;  %v661_v32 = vsel %vm629_vm8, %v581_v21, %v645_v24  ;;  %v691_v33 = vpack.c.bf16 %v663_v26, %v662_v25  ;;  %v2946_v24 = vld [vmem:[%s3850_s5 + $0x10] sm:$0xff]   ;;  %v2947_v25 = vld [vmem:[%s3850_s5 + $0x18] sm:$0xff]   ;;  %v2948_v26 = vld [vmem:[%s3850_s5 + $0x20] sm:$0xff]  }
 0x1eb   :  { %v602_v34 = vadd.f32 %v2734_v27, %v452_v17  ;;  %v593_v35 = vpop.f32.mrb[9].mxu1  ;;  %v690_v37 = vpack.c.bf16 %v661_v32, %v660_v31  ;;  %v2949_v27 = vld [vmem:[%s3850_s5 + $0x28] sm:$0xff]   ;;  %v2950_v31 = vld [vmem:[%s3850_s5 + $0x30] sm:$0xff]   ;;  %v2951_v32 = vld [vmem:[%s3850_s5 + $0x38] sm:$0xff]  }
 0x1ec   :  { %v594_v39 = vadd.f32 %v593_v35, %v442_v58  ;;  %v2735_v40 = vpop.f32.mrb[10].mxu1  ;;  %v720_v35 = vpop.permute.xlu1 %719 }
 0x1ed   :  { %v650_v41 = vmul.f32 0.1, %v602_v34  ;;  %v605_v42 = vadd.f32 %v2735_v40, %v457_v23  ;;  %v596_v43 = vpop.f32.mrb[11].mxu1  ;;  %2744 = vmatprep.subr.bf16.mxu0 %v690_v37  ;;  %vm634_vm9 = vcmp.ge.f32.partialorder %v602_v34, 0.0  ;;  %v2945_v23 = vld [vmem:[%s3850_s5 + $0x8] sm:$0xff]  }
 0x1ee   :  { %v648_v45 = vmul.f32 0.1, %v594_v39  ;;  %v597_v49 = vadd.f32 %v596_v43, %v447_v63  ;;  %2745 = vmatpush3.bf16.msra.mxu0 %v690_v37  ;;  %vm632_vm10 = vcmp.ge.f32.partialorder %v594_v39, 0.0 }
 0x1ef   :  { %vm635_vm11 = vcmp.ge.f32.partialorder %v605_v42, 0.0  ;;  %v651_v50 = vmul.f32 0.1, %v605_v42  ;;  %2746 = vmatprep.subr.bf16.mxu0 %v691_v33  ;;  %v666_v52 = vsel %vm634_vm9, %v602_v34, %v650_v41  ;;  %v715_v34 = vpop.permute.xlu0 %714 }
 0x1f0   :  { %vm633_vm12 = vcmp.ge.f32.partialorder %v597_v49, 0.0  ;;  %v649_v51 = vmul.f32 0.1, %v597_v49  ;;  %v664_v57 = vsel %vm632_vm10, %v594_v39, %v648_v45 }
 0x1f1   :  { %v667_v53 = vsel %vm635_vm11, %v605_v42, %v651_v50 }
 0x1f2   :  { %v2738_v56 = vpop.f32.mrb[12].mxu1  ;;  %2747 = vmatpush3.bf16.msra.mxu0 %v691_v33  ;;  %v665_v58 = vsel %vm633_vm12, %v597_v49, %v649_v51  ;;  %v693_v59 = vpack.c.bf16 %v667_v53, %v666_v52  ;;  %v2952_v33 = vld [vmem:[%s3848_s3 + $0x40] sm:$0xff]  }
 0x1f3   :  { %v618_v60 = vadd.f32 %v2738_v56, %v472_v55  ;;  %v609_v62 = vpop.f32.mrb[13].mxu1  ;;  %v692_v0 = vpack.c.bf16 %v665_v58, %v664_v57  ;;  %2788 = vmatprep.mubr.bf16.mxu1 %v2952_v33  ;;  %v725_v37 = vpop.permute.xlu0 %724 }
 0x1f4   :  { %v610_v63 = vadd.f32 %v609_v62, %v462_v38  ;;  %v2739_v61 = vpop.f32.mrb[14].mxu1  ;;  %v730_v38 = vpop.permute.xlu1 %729 }
 0x1f5   :  { %v654_v5 = vmul.f32 0.1, %v618_v60  ;;  %v621_v6 = vadd.f32 %v2739_v61, %v477_v4  ;;  %v612_v8 = vpop.f32.mrb[15].mxu1  ;;  %2748 = vmatprep.subr.bf16.mxu0 %v692_v0  ;;  %vm638_vm13 = vcmp.ge.f32.partialorder %v618_v60, 0.0 }
 0x1f6   :  { %v652_v10 = vmul.f32 0.1, %v610_v63  ;;  %v613_v12 = vadd.f32 %v612_v8, %v467_v44  ;;  %2749 = vmatpush3.bf16.msra.mxu0 %v692_v0  ;;  %vm636_vm14 = vcmp.ge.f32.partialorder %v610_v63, 0.0 }
 0x1f7   :  { %vm639_vm15 = vcmp.ge.f32.partialorder %v621_v6, 0.0  ;;  %v655_v13 = vmul.f32 0.1, %v621_v6  ;;  %2750 = vmatprep.subr.bf16.mxu0 %v693_v59  ;;  %v670_v15 = vsel %vm638_vm13, %v618_v60, %v654_v5  ;;  %v735_v39 = vpop.permute.xlu0 %734 }
 0x1f8   :  { %vm637_vm0 = vcmp.ge.f32.partialorder %v613_v12, 0.0  ;;  %v653_v14 = vmul.f32 0.1, %v613_v12  ;;  %v668_v17 = vsel %vm636_vm14, %v610_v63, %v652_v10  ;;  %v740_v40 = vpop.permute.xlu1 %739 }
 0x1f9   :  { %v671_v16 = vsel %vm639_vm15, %v621_v6, %v655_v13 }
 0x1fa   :  { %2751 = vmatpush3.bf16.msra.mxu0 %v693_v59  ;;  %v669_v11 = vsel %vm637_vm0, %v613_v12, %v653_v14  ;;  %v695_v21 = vpack.c.bf16 %v671_v16, %v670_v15 }
 0x1fb   :  { %v694_v22 = vpack.c.bf16 %v669_v11, %v668_v17  ;;  %v745_v41 = vpop.permute.xlu0 %744 }
 0x1fc   :  { %v750_v45 = vpop.permute.xlu1 %749 }
 0x1fd   :  { %2752 = vmatprep.subr.bf16.mxu0 %v694_v22 }
 0x1fe   :  { %2753 = vmatpush3.bf16.msra.mxu0 %v694_v22 }
 0x1ff   :  { %2754 = vmatprep.subr.bf16.mxu0 %v695_v21  ;;  %v755_v58 = vpop.permute.xlu0 %754 }
 0x200   :  { %v760_v0 = vpop.permute.xlu1 %759 }
 0x202   :  { %2755 = vmatpush3.bf16.msra.mxu0 %v695_v21 }
 0x203   :  { %v765_v14 = vpop.permute.xlu0 %764 }
 0x205   :  { %2757 = vmatmul.mubr.bf16.vlgmr.msra.gmra.mrb[16].mxu0 %v2945_v23  ;;  %v770_v23 = vpop.permute.xlu1 %769 }
 0x206   :  { %2760 = vmatprep.mubr.bf16.mxu0 %v2946_v24 }
 0x20d   :  { %2761 = vmatmul.mubr.bf16.gmra.mrb[20].mxu0 %v2947_v25 }
 0x20e   :  { %2764 = vmatprep.mubr.bf16.mxu0 %v2948_v26 }
 0x215   :  { %2765 = vmatmul.mubr.bf16.gmra.mrb[24].mxu0 %v2949_v27 }
 0x216   :  { %2768 = vmatprep.mubr.bf16.mxu0 %v2950_v31 }
 0x21d   :  { %2769 = vmatmul.mubr.bf16.gmra.mrb[28].mxu0 %v2951_v32  ;;  %v775_v32 = vpop.permute.xlu0 %774 }
 0x2d8   :  { %v2758_v42 = vpop.f32.mrb[16].mxu0 }
 0x2d9   :  { %v883_v43 = vadd.f32 %v2758_v42, %v725_v37  ;;  %v874_v44 = vpop.f32.mrb[17].mxu0 }
 0x2da   :  { %v875_v49 = vadd.f32 %v874_v44, %v715_v34  ;;  %v2759_v50 = vpop.f32.mrb[18].mxu0 }
 0x2db   :  { %v886_v51 = vadd.f32 %v2759_v50, %v730_v38  ;;  %v877_v52 = vpop.f32.mrb[19].mxu0  ;;  %v939_v53 = vadd.f32 %v883_v43, %v3477_v36 }
 0x2dc   :  { %v937_v55 = vadd.f32 %v875_v49, %v3468_v28  ;;  %v878_v56 = vadd.f32 %v877_v52, %v720_v35 }
 0x2dd   :  { %v940_v57 = vadd.f32 %v886_v51, %v3472_v30  ;;  %v971_v4 = vmul.f32 0.1, %v939_v53  ;;  %vm955_vm4 = vcmp.ge.f32.partialorder %v939_v53, 0.0 }
 0x2de   :  { %v969_v59 = vmul.f32 0.1, %v937_v55  ;;  %v938_v60 = vadd.f32 %v878_v56, %v3470_v29  ;;  %vm953_vm1 = vcmp.ge.f32.partialorder %v937_v55, 0.0 }
 0x2df   :  { %vm956_vm2 = vcmp.ge.f32.partialorder %v940_v57, 0.0  ;;  %v972_v62 = vmul.f32 0.1, %v940_v57  ;;  %v3588_v11 = vsel %vm955_vm4, %v939_v53, %v971_v4 }
 0x2e0   :  { %vm954_vm3 = vcmp.ge.f32.partialorder %v938_v60, 0.0  ;;  %v970_v63 = vmul.f32 0.1, %v938_v60  ;;  %v2762_v61 = vpop.f32.mrb[20].mxu0  ;;  %v3578_v8 = vsel %vm953_vm1, %v937_v55, %v969_v59 }
 0x2e1   :  { %v899_v5 = vadd.f32 %v2762_v61, %v745_v41  ;;  %v890_v36 = vpop.f32.mrb[21].mxu0  ;;  %v3582_v10 = vsel %vm956_vm2, %v940_v57, %v972_v62  ;;  %v780_v41 = vpop.permute.xlu1 %779 }
 0x2e2   :  { %v891_v6 = vadd.f32 %v890_v36, %v735_v39  ;;  %v2763_v28 = vpop.f32.mrb[22].mxu0  ;;  %v3580_v30 = vsel %vm954_vm3, %v938_v60, %v970_v63  ;;  %v1019_v22 = vpack.c.bf16 %v3582_v10, %v3588_v11 }
 0x2e3   :  { %v902_v29 = vadd.f32 %v2763_v28, %v750_v45  ;;  %v893_v12 = vpop.f32.mrb[23].mxu0  ;;  %v1018_v13 = vpack.c.bf16 %v3580_v30, %v3578_v8  ;;  %v943_v15 = vadd.f32 %v899_v5, %v3493_v54 }
 0x2e4   :  { %v941_v16 = vadd.f32 %v891_v6, %v3483_v46  ;;  %v894_v17 = vadd.f32 %v893_v12, %v740_v40 }
 0x2e5   :  { %v944_v21 = vadd.f32 %v902_v29, %v3487_v48  ;;  %2772 = vmatprep.subr.bf16.mxu1 %v1018_v13  ;;  %v975_v54 = vmul.f32 0.1, %v943_v15  ;;  %vm959_vm8 = vcmp.ge.f32.partialorder %v943_v15, 0.0 }
 0x2e6   :  { %v973_v24 = vmul.f32 0.1, %v941_v16  ;;  %v942_v25 = vadd.f32 %v894_v17, %v3485_v47  ;;  %2773 = vmatpush3.bf16.msra.mxu1 %v1018_v13  ;;  %vm957_vm5 = vcmp.ge.f32.partialorder %v941_v16, 0.0 }
 0x2e7   :  { %vm960_vm6 = vcmp.ge.f32.partialorder %v944_v21, 0.0  ;;  %v976_v26 = vmul.f32 0.1, %v944_v21  ;;  %2774 = vmatprep.subr.bf16.mxu1 %v1019_v22  ;;  %v3606_v45 = vsel %vm959_vm8, %v943_v15, %v975_v54  ;;  %v2957_v54 = vld [vmem:[%s3848_s3 + $0x68] sm:$0xff]  }
 0x2e8   :  { %vm958_vm7 = vcmp.ge.f32.partialorder %v942_v25, 0.0  ;;  %v974_v46 = vmul.f32 0.1, %v942_v25  ;;  %v2766_v27 = vpop.f32.mrb[24].mxu0  ;;  %v3594_v35 = vsel %vm957_vm5, %v941_v16, %v973_v24  ;;  %v2954_v24 = vld [vmem:[%s3848_s3 + $0x50] sm:$0xff]  }
 0x2e9   :  { %v915_v31 = vadd.f32 %v2766_v27, %v765_v14  ;;  %v906_v48 = vpop.f32.mrb[25].mxu0  ;;  %v3599_v47 = vsel %vm960_vm6, %v944_v21, %v976_v26  ;;  %v2956_v26 = vld [vmem:[%s3848_s3 + $0x60] sm:$0xff]   ;;  %v2959_v27 = vld [vmem:[%s3848_s3 + $0x78] sm:$0xff]  }
 0x2ea   :  { %v907_v33 = vadd.f32 %v906_v48, %v755_v58  ;;  %v2767_v34 = vpop.f32.mrb[26].mxu0  ;;  %2775 = vmatpush3.bf16.msra.mxu1 %v1019_v22  ;;  %v3596_v37 = vsel %vm958_vm7, %v942_v25, %v974_v46  ;;  %v1021_v50 = vpack.c.bf16 %v3599_v47, %v3606_v45  ;;  %v790_v58 = vpop.permute.xlu1 %789  ;;  %v2955_v25 = vld [vmem:[%s3848_s3 + $0x58] sm:$0xff]   ;;  %v2958_v46 = vld [vmem:[%s3848_s3 + $0x70] sm:$0xff]  }
 0x2eb   :  { %v918_v38 = vadd.f32 %v2767_v34, %v770_v23  ;;  %v909_v39 = vpop.f32.mrb[27].mxu0  ;;  %v1020_v40 = vpack.c.bf16 %v3596_v37, %v3594_v35  ;;  %v947_v42 = vadd.f32 %v915_v31, %v3508_v9  ;;  %v785_v9 = vpop.permute.xlu0 %784  ;;  %v2953_v23 = vld [vmem:[%s3848_s3 + $0x48] sm:$0xff]   ;;  %v2960_v31 = vld [vmem:[%s3850_s5 + $0x40] sm:$0xff]  }
 0x2ec   :  { %v945_v43 = vadd.f32 %v907_v33, %v3499_v1  ;;  %v910_v44 = vadd.f32 %v909_v39, %v760_v0  ;;  %2820 = vmatprep.mubr.bf16.mxu0 %v2960_v31 }
 0x2ed   :  { %v948_v49 = vadd.f32 %v918_v38, %v3503_v3  ;;  %2776 = vmatprep.subr.bf16.mxu1 %v1020_v40  ;;  %v979_v1 = vmul.f32 0.1, %v947_v42  ;;  %vm963_vm12 = vcmp.ge.f32.partialorder %v947_v42, 0.0 }
 0x2ee   :  { %v977_v51 = vmul.f32 0.1, %v945_v43  ;;  %v946_v52 = vadd.f32 %v910_v44, %v3501_v2  ;;  %2777 = vmatpush3.bf16.msra.mxu1 %v1020_v40  ;;  %vm961_vm9 = vcmp.ge.f32.partialorder %v945_v43, 0.0 }
 0x2ef   :  { %vm964_vm10 = vcmp.ge.f32.partialorder %v948_v49, 0.0  ;;  %v980_v53 = vmul.f32 0.1, %v948_v49  ;;  %2778 = vmatprep.subr.bf16.mxu1 %v1021_v50  ;;  %v3625_v28 = vsel %vm963_vm12, %v947_v42, %v979_v1  ;;  %v1046_v48 = vpop.permute.xlu0 %1045 }
 0x2f0   :  { %vm962_vm11 = vcmp.ge.f32.partialorder %v946_v52, 0.0  ;;  %v978_v55 = vmul.f32 0.1, %v946_v52  ;;  %v2770_v56 = vpop.f32.mrb[28].mxu0  ;;  %v3613_v62 = vsel %vm961_vm9, %v945_v43, %v977_v51 }
 0x2f1   :  { %v931_v57 = vadd.f32 %v2770_v56, %v785_v9  ;;  %v922_v3 = vpop.f32.mrb[29].mxu0  ;;  %v3618_v0 = vsel %vm964_vm10, %v948_v49, %v980_v53 }
 0x2f2   :  { %v923_v59 = vadd.f32 %v922_v3, %v775_v32  ;;  %v2771_v60 = vpop.f32.mrb[30].mxu0  ;;  %2779 = vmatpush3.bf16.msra.mxu1 %v1021_v50  ;;  %v3615_v2 = vsel %vm962_vm11, %v946_v52, %v978_v55  ;;  %v1023_v12 = vpack.c.bf16 %v3618_v0, %v3625_v28  ;;  %v1051_v32 = vpop.permute.xlu1 %1050 }
 0x2f3   :  { %v934_v4 = vadd.f32 %v2771_v60, %v790_v58  ;;  %v925_v63 = vpop.f32.mrb[31].mxu0  ;;  %v1022_v61 = vpack.c.bf16 %v3615_v2, %v3613_v62  ;;  %v951_v5 = vadd.f32 %v931_v57, %v3522_v7  ;;  %v1056_v33 = vpop.permute.xlu0 %1055 }
 0x2f4   :  { %v949_v36 = vadd.f32 %v923_v59, %v3514_v18  ;;  %v926_v6 = vadd.f32 %v925_v63, %v780_v41 }
 0x2f5   :  { %v952_v29 = vadd.f32 %v934_v4, %v3518_v20  ;;  %2780 = vmatprep.subr.bf16.mxu1 %v1022_v61  ;;  %v983_v7 = vmul.f32 0.1, %v951_v5  ;;  %vm967_vm0 = vcmp.ge.f32.partialorder %v951_v5, 0.0 }
 0x2f6   :  { %v981_v13 = vmul.f32 0.1, %v949_v36  ;;  %v950_v14 = vadd.f32 %v926_v6, %v3516_v19  ;;  %2781 = vmatpush3.bf16.msra.mxu1 %v1022_v61  ;;  %vm965_vm13 = vcmp.ge.f32.partialorder %v949_v36, 0.0  ;;  %v1061_v34 = vpop.permute.xlu1 %1060 }
 0x2f7   :  { %vm968_vm14 = vcmp.ge.f32.partialorder %v952_v29, 0.0  ;;  %v984_v15 = vmul.f32 0.1, %v952_v29  ;;  %2782 = vmatprep.subr.bf16.mxu1 %v1023_v12  ;;  %v3639_v19 = vsel %vm967_vm0, %v951_v5, %v983_v7  ;;  %v1066_v38 = vpop.permute.xlu0 %1065 }
 0x2f8   :  { %vm966_vm15 = vcmp.ge.f32.partialorder %v950_v14, 0.0  ;;  %v982_v18 = vmul.f32 0.1, %v950_v14  ;;  %v3631_v16 = vsel %vm965_vm13, %v949_v36, %v981_v13 }
 0x2f9   :  { %v3635_v17 = vsel %vm968_vm14, %v952_v29, %v984_v15 }
 0x2fa   :  { %2783 = vmatpush3.bf16.msra.mxu1 %v1023_v12  ;;  %v3633_v20 = vsel %vm966_vm15, %v950_v14, %v982_v18  ;;  %v1025_v22 = vpack.c.bf16 %v3635_v17, %v3639_v19  ;;  %v1071_v39 = vpop.permute.xlu1 %1070 }
 0x2fb   :  { %v1024_v21 = vpack.c.bf16 %v3633_v20, %v3631_v16  ;;  %v1076_v40 = vpop.permute.xlu0 %1075 }
 0x2fd   :  { %2784 = vmatprep.subr.bf16.mxu1 %v1024_v21 }
 0x2fe   :  { %2785 = vmatpush3.bf16.msra.mxu1 %v1024_v21  ;;  %v1081_v44 = vpop.permute.xlu1 %1080 }
 0x2ff   :  { %2786 = vmatprep.subr.bf16.mxu1 %v1025_v22  ;;  %v1086_v56 = vpop.permute.xlu0 %1085 }
 0x302   :  { %2787 = vmatpush3.bf16.msra.mxu1 %v1025_v22  ;;  %v1091_v59 = vpop.permute.xlu1 %1090 }
 0x303   :  { %v1096_v7 = vpop.permute.xlu0 %1095 }
 0x305   :  { %2789 = vmatmul.mubr.bf16.vlgmr.msra.gmra.mrb[16].mxu1 %v2953_v23 }
 0x306   :  { %2792 = vmatprep.mubr.bf16.mxu1 %v2954_v24  ;;  %v1101_v23 = vpop.permute.xlu1 %1100 }
 0x30d   :  { %2793 = vmatmul.mubr.bf16.gmra.mrb[20].mxu1 %v2955_v25 }
 0x30e   :  { %2796 = vmatprep.mubr.bf16.mxu1 %v2956_v26 }
 0x315   :  { %2797 = vmatmul.mubr.bf16.gmra.mrb[24].mxu1 %v2957_v54 }
 0x316   :  { %2800 = vmatprep.mubr.bf16.mxu1 %v2958_v46 }
 0x31d   :  { %2801 = vmatmul.mubr.bf16.gmra.mrb[28].mxu1 %v2959_v27 }
 0x3d8   :  { %v2790_v41 = vpop.f32.mrb[16].mxu1 }
 0x3d9   :  { %v1214_v42 = vadd.f32 %v2790_v41, %v1056_v33  ;;  %v1205_v43 = vpop.f32.mrb[17].mxu1 }
 0x3da   :  { %v1206_v49 = vadd.f32 %v1205_v43, %v1046_v48  ;;  %v2791_v50 = vpop.f32.mrb[18].mxu1  ;;  %v1111_v43 = vpop.permute.xlu1 %1110 }
 0x3db   :  { %v1286_v51 = vmul.f32 0.1, %v1214_v42  ;;  %v1217_v52 = vadd.f32 %v2791_v50, %v1061_v34  ;;  %v1208_v53 = vpop.f32.mrb[19].mxu1  ;;  %vm1270_vm1 = vcmp.ge.f32.partialorder %v1214_v42, 0.0  ;;  %v1106_v34 = vpop.permute.xlu0 %1105 }
 0x3dc   :  { %v1284_v9 = vmul.f32 0.1, %v1206_v49  ;;  %v1209_v1 = vadd.f32 %v1208_v53, %v1051_v32  ;;  %vm1268_vm2 = vcmp.ge.f32.partialorder %v1206_v49, 0.0 }
 0x3dd   :  { %vm1271_vm3 = vcmp.ge.f32.partialorder %v1217_v52, 0.0  ;;  %v1287_v55 = vmul.f32 0.1, %v1217_v52  ;;  %v1302_v3 = vsel %vm1270_vm1, %v1214_v42, %v1286_v51 }
 0x3de   :  { %vm1269_vm4 = vcmp.ge.f32.partialorder %v1209_v1, 0.0  ;;  %v1285_v57 = vmul.f32 0.1, %v1209_v1  ;;  %v1300_v4 = vsel %vm1268_vm2, %v1206_v49, %v1284_v9 }
 0x3df   :  { %v1303_v58 = vsel %vm1271_vm3, %v1217_v52, %v1287_v55  ;;  %v1116_v9 = vpop.permute.xlu0 %1115 }
 0x3e0   :  { %v2794_v60 = vpop.f32.mrb[20].mxu1  ;;  %v1301_v63 = vsel %vm1269_vm4, %v1209_v1, %v1285_v57  ;;  %v1334_v61 = vpack.c.bf16 %v1303_v58, %v1302_v3 }
 0x3e1   :  { %v1230_v5 = vadd.f32 %v2794_v60, %v1076_v40  ;;  %v1221_v36 = vpop.f32.mrb[21].mxu1  ;;  %v1333_v6 = vpack.c.bf16 %v1301_v63, %v1300_v4  ;;  %v1121_v4 = vpop.permute.xlu1 %1120 }
 0x3e2   :  { %v1222_v29 = vadd.f32 %v1221_v36, %v1066_v38  ;;  %v2795_v12 = vpop.f32.mrb[22].mxu1 }
 0x3e3   :  { %v1290_v13 = vmul.f32 0.1, %v1230_v5  ;;  %v1233_v14 = vadd.f32 %v2795_v12, %v1081_v44  ;;  %v1224_v15 = vpop.f32.mrb[23].mxu1  ;;  %2804 = vmatprep.subr.bf16.mxu0 %v1333_v6  ;;  %vm1274_vm5 = vcmp.ge.f32.partialorder %v1230_v5, 0.0 }
 0x3e4   :  { %v1288_v18 = vmul.f32 0.1, %v1222_v29  ;;  %v1225_v21 = vadd.f32 %v1224_v15, %v1071_v39  ;;  %2805 = vmatpush3.bf16.msra.mxu0 %v1333_v6  ;;  %vm1272_vm6 = vcmp.ge.f32.partialorder %v1222_v29, 0.0 }
 0x3e5   :  { %vm1275_vm7 = vcmp.ge.f32.partialorder %v1233_v14, 0.0  ;;  %v1291_v22 = vmul.f32 0.1, %v1233_v14  ;;  %2806 = vmatprep.subr.bf16.mxu0 %v1334_v61  ;;  %v1306_v25 = vsel %vm1274_vm5, %v1230_v5, %v1290_v13 }
 0x3e6   :  { %vm1273_vm8 = vcmp.ge.f32.partialorder %v1225_v21, 0.0  ;;  %v1289_v24 = vmul.f32 0.1, %v1225_v21  ;;  %v1304_v46 = vsel %vm1272_vm6, %v1222_v29, %v1288_v18 }
 0x3e7   :  { %v1307_v26 = vsel %vm1275_vm7, %v1233_v14, %v1291_v22 }
 0x3e8   :  { %v2798_v54 = vpop.f32.mrb[24].mxu1  ;;  %2807 = vmatpush3.bf16.msra.mxu0 %v1334_v61  ;;  %v1305_v27 = vsel %vm1273_vm8, %v1225_v21, %v1289_v24  ;;  %v1336_v31 = vpack.c.bf16 %v1307_v26, %v1306_v25  ;;  %v2962_v24 = vld [vmem:[%s3850_s5 + $0x50] sm:$0xff]   ;;  %v2963_v25 = vld [vmem:[%s3850_s5 + $0x58] sm:$0xff]   ;;  %v2964_v26 = vld [vmem:[%s3850_s5 + $0x60] sm:$0xff]  }
 0x3e9   :  { %v1246_v48 = vadd.f32 %v2798_v54, %v1096_v7  ;;  %v1237_v32 = vpop.f32.mrb[25].mxu1  ;;  %v1335_v33 = vpack.c.bf16 %v1305_v27, %v1304_v46  ;;  %v2965_v54 = vld [vmem:[%s3850_s5 + $0x68] sm:$0xff]   ;;  %v2966_v46 = vld [vmem:[%s3850_s5 + $0x70] sm:$0xff]   ;;  %v2967_v27 = vld [vmem:[%s3850_s5 + $0x78] sm:$0xff]  }
 0x3ea   :  { %v1238_v38 = vadd.f32 %v1237_v32, %v1086_v56  ;;  %v2799_v39 = vpop.f32.mrb[26].mxu1  ;;  %v1366_v32 = vpop.permute.xlu1 %1365 }
 0x3eb   :  { %v1294_v40 = vmul.f32 0.1, %v1246_v48  ;;  %v1249_v41 = vadd.f32 %v2799_v39, %v1101_v23  ;;  %v1240_v42 = vpop.f32.mrb[27].mxu1  ;;  %2808 = vmatprep.subr.bf16.mxu0 %v1335_v33  ;;  %vm1278_vm9 = vcmp.ge.f32.partialorder %v1246_v48, 0.0  ;;  %v2961_v23 = vld [vmem:[%s3850_s5 + $0x48] sm:$0xff]  }
 0x3ec   :  { %v1292_v44 = vmul.f32 0.1, %v1238_v38  ;;  %v1241_v49 = vadd.f32 %v1240_v42, %v1091_v59  ;;  %2809 = vmatpush3.bf16.msra.mxu0 %v1335_v33  ;;  %vm1276_vm10 = vcmp.ge.f32.partialorder %v1238_v38, 0.0 }
 0x3ed   :  { %vm1279_vm11 = vcmp.ge.f32.partialorder %v1249_v41, 0.0  ;;  %v1295_v50 = vmul.f32 0.1, %v1249_v41  ;;  %2810 = vmatprep.subr.bf16.mxu0 %v1336_v31  ;;  %v1310_v52 = vsel %vm1278_vm9, %v1246_v48, %v1294_v40  ;;  %v1361_v48 = vpop.permute.xlu0 %1360 }
 0x3ee   :  { %vm1277_vm12 = vcmp.ge.f32.partialorder %v1241_v49, 0.0  ;;  %v1293_v51 = vmul.f32 0.1, %v1241_v49  ;;  %v1308_v55 = vsel %vm1276_vm10, %v1238_v38, %v1292_v44 }
 0x3ef   :  { %v1311_v53 = vsel %vm1279_vm11, %v1249_v41, %v1295_v50 }
 0x3f0   :  { %v2802_v1 = vpop.f32.mrb[28].mxu1  ;;  %2811 = vmatpush3.bf16.msra.mxu0 %v1336_v31  ;;  %v1309_v56 = vsel %vm1277_vm12, %v1241_v49, %v1293_v51  ;;  %v1338_v57 = vpack.c.bf16 %v1311_v53, %v1310_v52  ;;  %v2968_v31 = vld [vmem:[%s3848_s3 + $0x80] sm:$0xff]  }
 0x3f1   :  { %v1262_v3 = vadd.f32 %v2802_v1, %v1116_v9  ;;  %v1253_v58 = vpop.f32.mrb[29].mxu1  ;;  %v1337_v60 = vpack.c.bf16 %v1309_v56, %v1308_v55  ;;  %2852 = vmatprep.mubr.bf16.mxu1 %v2968_v31  ;;  %v1371_v33 = vpop.permute.xlu0 %1370 }
 0x3f2   :  { %v1254_v59 = vadd.f32 %v1253_v58, %v1106_v34  ;;  %v2803_v63 = vpop.f32.mrb[30].mxu1  ;;  %v1376_v34 = vpop.permute.xlu1 %1375 }
 0x3f3   :  { %v1298_v61 = vmul.f32 0.1, %v1262_v3  ;;  %v1265_v5 = vadd.f32 %v2803_v63, %v1121_v4  ;;  %v1256_v36 = vpop.f32.mrb[31].mxu1  ;;  %2812 = vmatprep.subr.bf16.mxu0 %v1337_v60  ;;  %vm1282_vm13 = vcmp.ge.f32.partialorder %v1262_v3, 0.0 }
 0x3f4   :  { %v1296_v6 = vmul.f32 0.1, %v1254_v59  ;;  %v1257_v29 = vadd.f32 %v1256_v36, %v1111_v43  ;;  %2813 = vmatpush3.bf16.msra.mxu0 %v1337_v60  ;;  %vm1280_vm14 = vcmp.ge.f32.partialorder %v1254_v59, 0.0 }
 0x3f5   :  { %vm1283_vm15 = vcmp.ge.f32.partialorder %v1265_v5, 0.0  ;;  %v1299_v12 = vmul.f32 0.1, %v1265_v5  ;;  %2814 = vmatprep.subr.bf16.mxu0 %v1338_v57  ;;  %v1314_v14 = vsel %vm1282_vm13, %v1262_v3, %v1298_v61  ;;  %v1381_v38 = vpop.permute.xlu0 %1380 }
 0x3f6   :  { %vm1281_vm0 = vcmp.ge.f32.partialorder %v1257_v29, 0.0  ;;  %v1297_v13 = vmul.f32 0.1, %v1257_v29  ;;  %v1312_v7 = vsel %vm1280_vm14, %v1254_v59, %v1296_v6  ;;  %v1386_v39 = vpop.permute.xlu1 %1385 }
 0x3f7   :  { %v1315_v15 = vsel %vm1283_vm15, %v1265_v5, %v1299_v12 }
 0x3f8   :  { %2815 = vmatpush3.bf16.msra.mxu0 %v1338_v57  ;;  %v1313_v18 = vsel %vm1281_vm0, %v1257_v29, %v1297_v13  ;;  %v1340_v21 = vpack.c.bf16 %v1315_v15, %v1314_v14 }
 0x3f9   :  { %v1339_v22 = vpack.c.bf16 %v1313_v18, %v1312_v7  ;;  %v1391_v40 = vpop.permute.xlu0 %1390 }
 0x3fa   :  { %v1396_v44 = vpop.permute.xlu1 %1395 }
 0x3fb   :  { %2816 = vmatprep.subr.bf16.mxu0 %v1339_v22 }
 0x3fc   :  { %2817 = vmatpush3.bf16.msra.mxu0 %v1339_v22 }
 0x3fd   :  { %2818 = vmatprep.subr.bf16.mxu0 %v1340_v21  ;;  %v1401_v56 = vpop.permute.xlu0 %1400 }
 0x3fe   :  { %v1406_v60 = vpop.permute.xlu1 %1405 }
 0x400   :  { %2819 = vmatpush3.bf16.msra.mxu0 %v1340_v21 }
 0x401   :  { %v1411_v13 = vpop.permute.xlu0 %1410 }
 0x403   :  { %2821 = vmatmul.mubr.bf16.vlgmr.msra.gmra.mrb[32].mxu0 %v2961_v23  ;;  %v1416_v23 = vpop.permute.xlu1 %1415 }
 0x404   :  { %2824 = vmatprep.mubr.bf16.mxu0 %v2962_v24 }
 0x40b   :  { %2825 = vmatmul.mubr.bf16.gmra.mrb[36].mxu0 %v2963_v25 }
 0x40c   :  { %2828 = vmatprep.mubr.bf16.mxu0 %v2964_v26 }
 0x413   :  { %2829 = vmatmul.mubr.bf16.gmra.mrb[40].mxu0 %v2965_v54 }
 0x414   :  { %2832 = vmatprep.mubr.bf16.mxu0 %v2966_v46 }
 0x41b   :  { %2833 = vmatmul.mubr.bf16.gmra.mrb[44].mxu0 %v2967_v27  ;;  %v1421_v27 = vpop.permute.xlu0 %1420 }
 0x4d6   :  { %v2822_v41 = vpop.f32.mrb[32].mxu0 }
 0x4d7   :  { %v1529_v42 = vadd.f32 %v2822_v41, %v1371_v33  ;;  %v1520_v43 = vpop.f32.mrb[33].mxu0 }
 0x4d8   :  { %v1521_v49 = vadd.f32 %v1520_v43, %v1361_v48  ;;  %v2823_v50 = vpop.f32.mrb[34].mxu0 }
 0x4d9   :  { %v1532_v51 = vadd.f32 %v2823_v50, %v1376_v34  ;;  %v1523_v52 = vpop.f32.mrb[35].mxu0  ;;  %v1585_v53 = vadd.f32 %v1529_v42, %v3588_v11 }
 0x4da   :  { %v1583_v9 = vadd.f32 %v1521_v49, %v3578_v8  ;;  %v1524_v1 = vadd.f32 %v1523_v52, %v1366_v32 }
 0x4db   :  { %v1586_v55 = vadd.f32 %v1532_v51, %v3582_v10  ;;  %v1617_v4 = vmul.f32 0.1, %v1585_v53  ;;  %vm1601_vm4 = vcmp.ge.f32.partialorder %v1585_v53, 0.0 }
 0x4dc   :  { %v1615_v57 = vmul.f32 0.1, %v1583_v9  ;;  %v1584_v3 = vadd.f32 %v1524_v1, %v3580_v30  ;;  %vm1599_vm1 = vcmp.ge.f32.partialorder %v1583_v9, 0.0 }
 0x4dd   :  { %vm1602_vm2 = vcmp.ge.f32.partialorder %v1586_v55, 0.0  ;;  %v1618_v58 = vmul.f32 0.1, %v1586_v55  ;;  %v3705_v18 = vsel %vm1601_vm4, %v1585_v53, %v1617_v4 }
 0x4de   :  { %vm1600_vm3 = vcmp.ge.f32.partialorder %v1584_v3, 0.0  ;;  %v1616_v59 = vmul.f32 0.1, %v1584_v3  ;;  %v2826_v63 = vpop.f32.mrb[36].mxu0  ;;  %v3695_v36 = vsel %vm1599_vm1, %v1583_v9, %v1615_v57 }
 0x4df   :  { %v1545_v61 = vadd.f32 %v2826_v63, %v1391_v40  ;;  %v1536_v11 = vpop.f32.mrb[37].mxu0  ;;  %v3699_v6 = vsel %vm1602_vm2, %v1586_v55, %v1618_v58  ;;  %v1426_v40 = vpop.permute.xlu1 %1425 }
 0x4e0   :  { %v1537_v5 = vadd.f32 %v1536_v11, %v1381_v38  ;;  %v2827_v8 = vpop.f32.mrb[38].mxu0  ;;  %v3697_v10 = vsel %vm1600_vm3, %v1584_v3, %v1616_v59  ;;  %v1665_v22 = vpack.c.bf16 %v3699_v6, %v3705_v18 }
 0x4e1   :  { %v1548_v30 = vadd.f32 %v2827_v8, %v1396_v44  ;;  %v1539_v29 = vpop.f32.mrb[39].mxu0  ;;  %v1664_v12 = vpack.c.bf16 %v3697_v10, %v3695_v36  ;;  %v1589_v14 = vadd.f32 %v1545_v61, %v3606_v45 }
 0x4e2   :  { %v1587_v15 = vadd.f32 %v1537_v5, %v3594_v35  ;;  %v1540_v7 = vadd.f32 %v1539_v29, %v1386_v39 }
 0x4e3   :  { %v1590_v21 = vadd.f32 %v1548_v30, %v3599_v47  ;;  %2836 = vmatprep.subr.bf16.mxu1 %v1664_v12  ;;  %v1621_v45 = vmul.f32 0.1, %v1589_v14  ;;  %vm1605_vm8 = vcmp.ge.f32.partialorder %v1589_v14, 0.0 }
 0x4e4   :  { %v1619_v24 = vmul.f32 0.1, %v1587_v15  ;;  %v1588_v25 = vadd.f32 %v1540_v7, %v3596_v37  ;;  %2837 = vmatpush3.bf16.msra.mxu1 %v1664_v12  ;;  %vm1603_vm5 = vcmp.ge.f32.partialorder %v1587_v15, 0.0 }
 0x4e5   :  { %vm1606_vm6 = vcmp.ge.f32.partialorder %v1590_v21, 0.0  ;;  %v1622_v26 = vmul.f32 0.1, %v1590_v21  ;;  %2838 = vmatprep.subr.bf16.mxu1 %v1665_v22  ;;  %v3723_v44 = vsel %vm1605_vm8, %v1589_v14, %v1621_v45  ;;  %v2973_v45 = vld [vmem:[%s3848_s3 + $0xa8] sm:$0xff]  }
 0x4e6   :  { %vm1604_vm7 = vcmp.ge.f32.partialorder %v1588_v25, 0.0  ;;  %v1620_v35 = vmul.f32 0.1, %v1588_v25  ;;  %v2830_v54 = vpop.f32.mrb[40].mxu0  ;;  %v3711_v32 = vsel %vm1603_vm5, %v1587_v15, %v1619_v24  ;;  %v2970_v24 = vld [vmem:[%s3848_s3 + $0x90] sm:$0xff]  }
 0x4e7   :  { %v1561_v46 = vadd.f32 %v2830_v54, %v1411_v13  ;;  %v1552_v47 = vpop.f32.mrb[41].mxu0  ;;  %v3716_v37 = vsel %vm1606_vm6, %v1590_v21, %v1622_v26  ;;  %v2972_v26 = vld [vmem:[%s3848_s3 + $0xa0] sm:$0xff]   ;;  %v2975_v54 = vld [vmem:[%s3848_s3 + $0xb8] sm:$0xff]  }
 0x4e8   :  { %v1553_v31 = vadd.f32 %v1552_v47, %v1401_v56  ;;  %v2831_v48 = vpop.f32.mrb[42].mxu0  ;;  %2839 = vmatpush3.bf16.msra.mxu1 %v1665_v22  ;;  %v3713_v33 = vsel %vm1604_vm7, %v1588_v25, %v1620_v35  ;;  %v1667_v50 = vpack.c.bf16 %v3716_v37, %v3723_v44  ;;  %v1436_v56 = vpop.permute.xlu1 %1435  ;;  %v2971_v25 = vld [vmem:[%s3848_s3 + $0x98] sm:$0xff]   ;;  %v2974_v35 = vld [vmem:[%s3848_s3 + $0xb0] sm:$0xff]  }
 0x4e9   :  { %v1564_v34 = vadd.f32 %v2831_v48, %v1416_v23  ;;  %v1555_v38 = vpop.f32.mrb[43].mxu0  ;;  %v1666_v39 = vpack.c.bf16 %v3713_v33, %v3711_v32  ;;  %v1593_v41 = vadd.f32 %v1561_v46, %v3625_v28  ;;  %v1431_v28 = vpop.permute.xlu0 %1430  ;;  %v2969_v23 = vld [vmem:[%s3848_s3 + $0x88] sm:$0xff]   ;;  %v2976_v46 = vld [vmem:[%s3850_s5 + $0x80] sm:$0xff]  }
 0x4ea   :  { %v1591_v42 = vadd.f32 %v1553_v31, %v3613_v62  ;;  %v1556_v43 = vadd.f32 %v1555_v38, %v1406_v60  ;;  %2884 = vmatprep.mubr.bf16.mxu0 %v2976_v46 }
 0x4eb   :  { %v1594_v49 = vadd.f32 %v1564_v34, %v3618_v0  ;;  %2840 = vmatprep.subr.bf16.mxu1 %v1666_v39  ;;  %v1625_v62 = vmul.f32 0.1, %v1593_v41  ;;  %vm1609_vm12 = vcmp.ge.f32.partialorder %v1593_v41, 0.0 }
 0x4ec   :  { %v1623_v51 = vmul.f32 0.1, %v1591_v42  ;;  %v1592_v52 = vadd.f32 %v1556_v43, %v3615_v2  ;;  %2841 = vmatpush3.bf16.msra.mxu1 %v1666_v39  ;;  %vm1607_vm9 = vcmp.ge.f32.partialorder %v1591_v42, 0.0 }
 0x4ed   :  { %vm1610_vm10 = vcmp.ge.f32.partialorder %v1594_v49, 0.0  ;;  %v1626_v53 = vmul.f32 0.1, %v1594_v49  ;;  %2842 = vmatprep.subr.bf16.mxu1 %v1667_v50  ;;  %v3742_v8 = vsel %vm1609_vm12, %v1593_v41, %v1625_v62  ;;  %v1692_v47 = vpop.permute.xlu0 %1691 }
 0x4ee   :  { %vm1608_vm11 = vcmp.ge.f32.partialorder %v1592_v52, 0.0  ;;  %v1624_v9 = vmul.f32 0.1, %v1592_v52  ;;  %v2834_v1 = vpop.f32.mrb[44].mxu0  ;;  %v3730_v58 = vsel %vm1607_vm9, %v1591_v42, %v1623_v51 }
 0x4ef   :  { %v1577_v55 = vadd.f32 %v2834_v1, %v1431_v28  ;;  %v1568_v0 = vpop.f32.mrb[45].mxu0  ;;  %v3735_v60 = vsel %vm1610_vm10, %v1594_v49, %v1626_v53 }
 0x4f0   :  { %v1569_v57 = vadd.f32 %v1568_v0, %v1421_v27  ;;  %v2835_v3 = vpop.f32.mrb[46].mxu0  ;;  %2843 = vmatpush3.bf16.msra.mxu1 %v1667_v50  ;;  %v3732_v2 = vsel %vm1608_vm11, %v1592_v52, %v1624_v9  ;;  %v1669_v29 = vpack.c.bf16 %v3735_v60, %v3742_v8  ;;  %v1697_v27 = vpop.permute.xlu1 %1696 }
 0x4f1   :  { %v1580_v4 = vadd.f32 %v2835_v3, %v1436_v56  ;;  %v1571_v59 = vpop.f32.mrb[47].mxu0  ;;  %v1668_v63 = vpack.c.bf16 %v3732_v2, %v3730_v58  ;;  %v1597_v61 = vadd.f32 %v1577_v55, %v3639_v19  ;;  %v1702_v31 = vpop.permute.xlu0 %1701 }
 0x4f2   :  { %v1595_v11 = vadd.f32 %v1569_v57, %v3631_v16  ;;  %v1572_v5 = vadd.f32 %v1571_v59, %v1426_v40 }
 0x4f3   :  { %v1598_v30 = vadd.f32 %v1580_v4, %v3635_v17  ;;  %2844 = vmatprep.subr.bf16.mxu1 %v1668_v63  ;;  %v1629_v19 = vmul.f32 0.1, %v1597_v61  ;;  %vm1613_vm0 = vcmp.ge.f32.partialorder %v1597_v61, 0.0 }
 0x4f4   :  { %v1627_v12 = vmul.f32 0.1, %v1595_v11  ;;  %v1596_v13 = vadd.f32 %v1572_v5, %v3633_v20  ;;  %2845 = vmatpush3.bf16.msra.mxu1 %v1668_v63  ;;  %vm1611_vm13 = vcmp.ge.f32.partialorder %v1595_v11, 0.0  ;;  %v1707_v48 = vpop.permute.xlu1 %1706 }
 0x4f5   :  { %vm1614_vm14 = vcmp.ge.f32.partialorder %v1598_v30, 0.0  ;;  %v1630_v14 = vmul.f32 0.1, %v1598_v30  ;;  %2846 = vmatprep.subr.bf16.mxu1 %v1669_v29  ;;  %v3756_v20 = vsel %vm1613_vm0, %v1597_v61, %v1629_v19  ;;  %v1712_v34 = vpop.permute.xlu0 %1711 }
 0x4f6   :  { %vm1612_vm15 = vcmp.ge.f32.partialorder %v1596_v13, 0.0  ;;  %v1628_v16 = vmul.f32 0.1, %v1596_v13  ;;  %v3748_v15 = vsel %vm1611_vm13, %v1595_v11, %v1627_v12 }
 0x4f7   :  { %v3752_v7 = vsel %vm1614_vm14, %v1598_v30, %v1630_v14 }
 0x4f8   :  { %2847 = vmatpush3.bf16.msra.mxu1 %v1669_v29  ;;  %v3750_v17 = vsel %vm1612_vm15, %v1596_v13, %v1628_v16  ;;  %v1671_v22 = vpack.c.bf16 %v3752_v7, %v3756_v20  ;;  %v1717_v38 = vpop.permute.xlu1 %1716 }
 0x4f9   :  { %v1670_v21 = vpack.c.bf16 %v3750_v17, %v3748_v15  ;;  %v1722_v39 = vpop.permute.xlu0 %1721 }
 0x4fb   :  { %2848 = vmatprep.subr.bf16.mxu1 %v1670_v21 }
 0x4fc   :  { %2849 = vmatpush3.bf16.msra.mxu1 %v1670_v21  ;;  %v1727_v43 = vpop.permute.xlu1 %1726 }
 0x4fd   :  { %2850 = vmatprep.subr.bf16.mxu1 %v1671_v22  ;;  %v1732_v1 = vpop.permute.xlu0 %1731 }
 0x500   :  { %2851 = vmatpush3.bf16.msra.mxu1 %v1671_v22  ;;  %v1737_v57 = vpop.permute.xlu1 %1736 }
 0x501   :  { %v1742_v19 = vpop.permute.xlu0 %1741 }
 0x503   :  { %2853 = vmatmul.mubr.bf16.vlgmr.msra.gmra.mrb[32].mxu1 %v2969_v23 }
 0x504   :  { %2856 = vmatprep.mubr.bf16.mxu1 %v2970_v24  ;;  %v1747_v23 = vpop.permute.xlu1 %1746 }
 0x50b   :  { %2857 = vmatmul.mubr.bf16.gmra.mrb[36].mxu1 %v2971_v25 }
 0x50c   :  { %2860 = vmatprep.mubr.bf16.mxu1 %v2972_v26 }
 0x513   :  { %2861 = vmatmul.mubr.bf16.gmra.mrb[40].mxu1 %v2973_v45 }
 0x514   :  { %2864 = vmatprep.mubr.bf16.mxu1 %v2974_v35 }
 0x51b   :  { %2865 = vmatmul.mubr.bf16.gmra.mrb[44].mxu1 %v2975_v54 }
 0x5d6   :  { %v2854_v40 = vpop.f32.mrb[32].mxu1 }
 0x5d7   :  { %v1860_v41 = vadd.f32 %v2854_v40, %v1702_v31  ;;  %v1851_v42 = vpop.f32.mrb[33].mxu1 }
 0x5d8   :  { %v1852_v49 = vadd.f32 %v1851_v42, %v1692_v47  ;;  %v2855_v50 = vpop.f32.mrb[34].mxu1  ;;  %v1757_v42 = vpop.permute.xlu1 %1756 }
 0x5d9   :  { %v1932_v51 = vmul.f32 0.1, %v1860_v41  ;;  %v1863_v52 = vadd.f32 %v2855_v50, %v1707_v48  ;;  %v1854_v53 = vpop.f32.mrb[35].mxu1  ;;  %vm1916_vm1 = vcmp.ge.f32.partialorder %v1860_v41, 0.0  ;;  %v1752_v48 = vpop.permute.xlu0 %1751 }
 0x5da   :  { %v1930_v28 = vmul.f32 0.1, %v1852_v49  ;;  %v1855_v62 = vadd.f32 %v1854_v53, %v1697_v27  ;;  %vm1914_vm2 = vcmp.ge.f32.partialorder %v1852_v49, 0.0 }
 0x5db   :  { %vm1917_vm3 = vcmp.ge.f32.partialorder %v1863_v52, 0.0  ;;  %v1933_v9 = vmul.f32 0.1, %v1863_v52  ;;  %v1948_v0 = vsel %vm1916_vm1, %v1860_v41, %v1932_v51  ;;  %vm3011_vm1 = vmmov 0  }
 0x5dc   :  { %vm1915_vm4 = vcmp.ge.f32.partialorder %v1855_v62, 0.0  ;;  %v1931_v55 = vmul.f32 0.1, %v1855_v62  ;;  %v1946_v4 = vsel %vm1914_vm2, %v1852_v49, %v1930_v28 }
 0x5dd   :  { %v1949_v56 = vsel %vm1917_vm3, %v1863_v52, %v1933_v9  ;;  %v1762_v28 = vpop.permute.xlu0 %1761 }
 0x5de   :  { %v2858_v3 = vpop.f32.mrb[36].mxu1  ;;  %v1947_v59 = vsel %vm1915_vm4, %v1855_v62, %v1931_v55  ;;  %v1980_v63 = vpack.c.bf16 %v1949_v56, %v1948_v0 }
 0x5df   :  { %v1876_v61 = vadd.f32 %v2858_v3, %v1722_v39  ;;  %v1867_v11 = vpop.f32.mrb[37].mxu1  ;;  %v1979_v5 = vpack.c.bf16 %v1947_v59, %v1946_v4  ;;  %v1767_v4 = vpop.permute.xlu1 %1766 }
 0x5e0   :  { %v1868_v30 = vadd.f32 %v1867_v11, %v1712_v34  ;;  %v2859_v29 = vpop.f32.mrb[38].mxu1 }
 0x5e1   :  { %v1936_v12 = vmul.f32 0.1, %v1876_v61  ;;  %v1879_v13 = vadd.f32 %v2859_v29, %v1727_v43  ;;  %v1870_v14 = vpop.f32.mrb[39].mxu1  ;;  %2868 = vmatprep.subr.bf16.mxu0 %v1979_v5  ;;  %vm1920_vm5 = vcmp.ge.f32.partialorder %v1876_v61, 0.0 }
 0x5e2   :  { %v1934_v16 = vmul.f32 0.1, %v1868_v30  ;;  %v1871_v21 = vadd.f32 %v1870_v14, %v1717_v38  ;;  %2869 = vmatpush3.bf16.msra.mxu0 %v1979_v5  ;;  %vm1918_vm6 = vcmp.ge.f32.partialorder %v1868_v30, 0.0 }
 0x5e3   :  { %vm1921_vm7 = vcmp.ge.f32.partialorder %v1879_v13, 0.0  ;;  %v1937_v22 = vmul.f32 0.1, %v1879_v13  ;;  %2870 = vmatprep.subr.bf16.mxu0 %v1980_v63  ;;  %v1952_v25 = vsel %vm1920_vm5, %v1876_v61, %v1936_v12 }
 0x5e4   :  { %vm1919_vm8 = vcmp.ge.f32.partialorder %v1871_v21, 0.0  ;;  %v1935_v24 = vmul.f32 0.1, %v1871_v21  ;;  %v1950_v35 = vsel %vm1918_vm6, %v1868_v30, %v1934_v16 }
 0x5e5   :  { %v1953_v26 = vsel %vm1921_vm7, %v1879_v13, %v1937_v22 }
 0x5e6   :  { %v2862_v45 = vpop.f32.mrb[40].mxu1  ;;  %2871 = vmatpush3.bf16.msra.mxu0 %v1980_v63  ;;  %v1951_v54 = vsel %vm1919_vm8, %v1871_v21, %v1935_v24  ;;  %v1982_v46 = vpack.c.bf16 %v1953_v26, %v1952_v25  ;;  %v2978_v24 = vld [vmem:[%s3850_s5 + $0x90] sm:$0xff]   ;;  %v2979_v25 = vld [vmem:[%s3850_s5 + $0x98] sm:$0xff]   ;;  %v2980_v26 = vld [vmem:[%s3850_s5 + $0xa0] sm:$0xff]  }
 0x5e7   :  { %v1892_v47 = vadd.f32 %v2862_v45, %v1742_v19  ;;  %v1883_v27 = vpop.f32.mrb[41].mxu1  ;;  %v1981_v31 = vpack.c.bf16 %v1951_v54, %v1950_v35  ;;  %v2981_v45 = vld [vmem:[%s3850_s5 + $0xa8] sm:$0xff]   ;;  %v2982_v35 = vld [vmem:[%s3850_s5 + $0xb0] sm:$0xff]   ;;  %v2983_v54 = vld [vmem:[%s3850_s5 + $0xb8] sm:$0xff]  }
 0x5e8   :  { %v1884_v34 = vadd.f32 %v1883_v27, %v1732_v1  ;;  %v2863_v38 = vpop.f32.mrb[42].mxu1  ;;  %v2012_v27 = vpop.permute.xlu1 %2011 }
 0x5e9   :  { %v1940_v39 = vmul.f32 0.1, %v1892_v47  ;;  %v1895_v40 = vadd.f32 %v2863_v38, %v1747_v23  ;;  %v1886_v41 = vpop.f32.mrb[43].mxu1  ;;  %2872 = vmatprep.subr.bf16.mxu0 %v1981_v31  ;;  %vm1924_vm9 = vcmp.ge.f32.partialorder %v1892_v47, 0.0  ;;  %v2977_v23 = vld [vmem:[%s3850_s5 + $0x88] sm:$0xff]  }
 0x5ea   :  { %v1938_v43 = vmul.f32 0.1, %v1884_v34  ;;  %v1887_v49 = vadd.f32 %v1886_v41, %v1737_v57  ;;  %2873 = vmatpush3.bf16.msra.mxu0 %v1981_v31  ;;  %vm1922_vm10 = vcmp.ge.f32.partialorder %v1884_v34, 0.0 }
 0x5eb   :  { %vm1925_vm11 = vcmp.ge.f32.partialorder %v1895_v40, 0.0  ;;  %v1941_v50 = vmul.f32 0.1, %v1895_v40  ;;  %2874 = vmatprep.subr.bf16.mxu0 %v1982_v46  ;;  %v1956_v52 = vsel %vm1924_vm9, %v1892_v47, %v1940_v39  ;;  %v2007_v47 = vpop.permute.xlu0 %2006 }
 0x5ec   :  { %vm1923_vm12 = vcmp.ge.f32.partialorder %v1887_v49, 0.0  ;;  %v1939_v51 = vmul.f32 0.1, %v1887_v49  ;;  %v1954_v9 = vsel %vm1922_vm10, %v1884_v34, %v1938_v43 }
 0x5ed   :  { %v1957_v53 = vsel %vm1925_vm11, %v1895_v40, %v1941_v50 }
 0x5ee   :  { %v2866_v62 = vpop.f32.mrb[44].mxu1  ;;  %2875 = vmatpush3.bf16.msra.mxu0 %v1982_v46  ;;  %v1955_v1 = vsel %vm1923_vm12, %v1887_v49, %v1939_v51  ;;  %v1984_v55 = vpack.c.bf16 %v1957_v53, %v1956_v52  ;;  %v3010_v46 = vmov 0.0  }
 0x5ef   :  { %v1908_v0 = vadd.f32 %v2866_v62, %v1762_v28  ;;  %v1899_v56 = vpop.f32.mrb[45].mxu1  ;;  %v1983_v3 = vpack.c.bf16 %v1955_v1, %v1954_v9  ;;  %2900 = vmatprep.subr.bf16.mxu1 %v3010_v46  ;;  %2916 = vmatprep.mubr.msk.bf16.mxu1 %vm3011_vm1, %v3010_v46  ;;  %v2017_v31 = vpop.permute.xlu0 %2016 }
 0x5f0   :  { %v1900_v57 = vadd.f32 %v1899_v56, %v1752_v48  ;;  %v2867_v59 = vpop.f32.mrb[46].mxu1  ;;  %v2022_v48 = vpop.permute.xlu1 %2021 }
 0x5f1   :  { %v1944_v63 = vmul.f32 0.1, %v1908_v0  ;;  %v1911_v61 = vadd.f32 %v2867_v59, %v1767_v4  ;;  %v1902_v11 = vpop.f32.mrb[47].mxu1  ;;  %2876 = vmatprep.subr.bf16.mxu0 %v1983_v3  ;;  %vm1928_vm13 = vcmp.ge.f32.partialorder %v1908_v0, 0.0 }
 0x5f2   :  { %v1942_v5 = vmul.f32 0.1, %v1900_v57  ;;  %v1903_v30 = vadd.f32 %v1902_v11, %v1757_v42  ;;  %2877 = vmatpush3.bf16.msra.mxu0 %v1983_v3  ;;  %vm1926_vm14 = vcmp.ge.f32.partialorder %v1900_v57, 0.0 }
 0x5f3   :  { %vm1929_vm15 = vcmp.ge.f32.partialorder %v1911_v61, 0.0  ;;  %v1945_v29 = vmul.f32 0.1, %v1911_v61  ;;  %2878 = vmatprep.subr.bf16.mxu0 %v1984_v55  ;;  %v1960_v13 = vsel %vm1928_vm13, %v1908_v0, %v1944_v63  ;;  %v2027_v34 = vpop.permute.xlu0 %2026 }
 0x5f4   :  { %vm1927_vm0 = vcmp.ge.f32.partialorder %v1903_v30, 0.0  ;;  %v1943_v12 = vmul.f32 0.1, %v1903_v30  ;;  %v1958_v19 = vsel %vm1926_vm14, %v1900_v57, %v1942_v5  ;;  %v2032_v38 = vpop.permute.xlu1 %2031 }
 0x5f5   :  { %v1961_v14 = vsel %vm1929_vm15, %v1911_v61, %v1945_v29 }
 0x5f6   :  { %2879 = vmatpush3.bf16.msra.mxu0 %v1984_v55  ;;  %v1959_v16 = vsel %vm1927_vm0, %v1903_v30, %v1943_v12  ;;  %v1986_v21 = vpack.c.bf16 %v1961_v14, %v1960_v13 }
 0x5f7   :  { %v1985_v22 = vpack.c.bf16 %v1959_v16, %v1958_v19  ;;  %v2037_v39 = vpop.permute.xlu0 %2036 }
 0x5f8   :  { %v2042_v43 = vpop.permute.xlu1 %2041 }
 0x5f9   :  { %2880 = vmatprep.subr.bf16.mxu0 %v1985_v22 }
 0x5fa   :  { %2881 = vmatpush3.bf16.msra.mxu0 %v1985_v22 }
 0x5fb   :  { %2882 = vmatprep.subr.bf16.mxu0 %v1986_v21  ;;  %v2047_v55 = vpop.permute.xlu0 %2046 }
 0x5fc   :  { %v2052_v4 = vpop.permute.xlu1 %2051 }
 0x5fe   :  { %2883 = vmatpush3.bf16.msra.mxu0 %v1986_v21 }
 0x5ff   :  { %v2057_v19 = vpop.permute.xlu0 %2056 }
 0x601   :  { %2885 = vmatmul.mubr.bf16.vlgmr.msra.gmra.mrb[48].mxu0 %v2977_v23 }
 0x602   :  { %2888 = vmatprep.mubr.bf16.mxu0 %v2978_v24  ;;  %v2062_v24 = vpop.permute.xlu1 %2061 }
 0x609   :  { %2889 = vmatmul.mubr.bf16.gmra.mrb[52].mxu0 %v2979_v25 }
 0x60a   :  { %2892 = vmatprep.mubr.bf16.mxu0 %v2980_v26 }
 0x611   :  { %2893 = vmatmul.mubr.bf16.gmra.mrb[56].mxu0 %v2981_v45 }
 0x612   :  { %2896 = vmatprep.mubr.bf16.mxu0 %v2982_v35 }
 0x619   :  { %2897 = vmatmul.mubr.bf16.gmra.mrb[60].mxu0 %v2983_v54 }
 0x6d4   :  { %v2886_v40 = vpop.f32.mrb[48].mxu0 }
 0x6d5   :  { %v2175_v41 = vadd.f32 %v2886_v40, %v2017_v31  ;;  %v2166_v42 = vpop.f32.mrb[49].mxu0 }
 0x6d6   :  { %v2167_v49 = vadd.f32 %v2166_v42, %v2007_v47  ;;  %v2887_v50 = vpop.f32.mrb[50].mxu0 }
 0x6d7   :  { %v2231_v51 = vadd.f32 %v2175_v41, %v3705_v18  ;;  %v2178_v52 = vadd.f32 %v2887_v50, %v2022_v48  ;;  %v2169_v53 = vpop.f32.mrb[51].mxu0 }
 0x6d8   :  { %v2229_v28 = vadd.f32 %v2167_v49, %v3695_v36  ;;  %v2170_v62 = vadd.f32 %v2169_v53, %v2012_v27 }
 0x6d9   :  { %v2263_v9 = vmul.f32 0.1, %v2231_v51  ;;  %v2232_v1 = vadd.f32 %v2178_v52, %v3699_v6  ;;  %vm2247_vm2 = vcmp.ge.f32.partialorder %v2231_v51, 0.0 }
 0x6da   :  { %v2261_v0 = vmul.f32 0.1, %v2229_v28  ;;  %v2230_v56 = vadd.f32 %v2170_v62, %v3697_v10  ;;  %vm2245_vm3 = vcmp.ge.f32.partialorder %v2229_v28, 0.0 }
 0x6db   :  { %vm2248_vm4 = vcmp.ge.f32.partialorder %v2232_v1, 0.0  ;;  %v2264_v3 = vmul.f32 0.1, %v2232_v1  ;;  %v2279_v59 = vsel %vm2247_vm2, %v2231_v51, %v2263_v9  ;;  %vm2364_vm2 = vcmask 261120  }
 0x6dc   :  { %vm2246_vm5 = vcmp.ge.f32.partialorder %v2230_v56, 0.0  ;;  %v2262_v57 = vmul.f32 0.1, %v2230_v56  ;;  %v2890_v18 = vpop.f32.mrb[52].mxu0  ;;  %v2277_v11 = vsel %vm2245_vm3, %v2229_v28, %v2261_v0 }
 0x6dd   :  { %v2280_v63 = vsel %vm2248_vm4, %v2232_v1, %v2264_v3  ;;  %v2191_v61 = vadd.f32 %v2890_v18, %v2037_v39  ;;  %v2182_v36 = vpop.f32.mrb[53].mxu0 }
 0x6de   :  { %v2278_v5 = vsel %vm2246_vm5, %v2230_v56, %v2262_v57  ;;  %v2183_v30 = vadd.f32 %v2182_v36, %v2027_v34  ;;  %v2891_v6 = vpop.f32.mrb[54].mxu0  ;;  %v2296_v29 = vpack.c.bf16 %v2280_v63, %v2279_v59 }
 0x6df   :  { %v2235_v12 = vadd.f32 %v2191_v61, %v3723_v44  ;;  %v2194_v13 = vadd.f32 %v2891_v6, %v2042_v43  ;;  %v2185_v10 = vpop.f32.mrb[55].mxu0  ;;  %v2295_v14 = vpack.c.bf16 %v2278_v5, %v2277_v11  ;;  %v2072_v43 = vpop.permute.xlu1 %2071 }
 0x6e0   :  { %v2233_v16 = vadd.f32 %v2183_v30, %v3711_v32  ;;  %v2186_v21 = vadd.f32 %v2185_v10, %v2032_v38 }
 0x6e1   :  { %v2267_v22 = vmul.f32 0.1, %v2235_v12  ;;  %v2236_v23 = vadd.f32 %v2194_v13, %v3716_v37  ;;  %2901 = vmatpush3.bf16.msra.mxu1 %v2295_v14  ;;  %vm2251_vm6 = vcmp.ge.f32.partialorder %v2235_v12, 0.0  ;;  %v2067_v37 = vpop.permute.xlu0 %2066 }
 0x6e2   :  { %v2265_v25 = vmul.f32 0.1, %v2233_v16  ;;  %v2234_v26 = vadd.f32 %v2186_v21, %v3713_v33  ;;  %2902 = vmatprep.subr.bf16.mxu1 %v3010_v46  ;;  %vm2249_vm7 = vcmp.ge.f32.partialorder %v2233_v16, 0.0 }
 0x6e3   :  { %vm2252_vm8 = vcmp.ge.f32.partialorder %v2236_v23, 0.0  ;;  %v2268_v44 = vmul.f32 0.1, %v2236_v23  ;;  %v2283_v54 = vsel %vm2251_vm6, %v2235_v12, %v2267_v22 }
 0x6e4   :  { %vm2250_vm9 = vcmp.ge.f32.partialorder %v2234_v26, 0.0  ;;  %v2266_v45 = vmul.f32 0.1, %v2234_v26  ;;  %v2894_v35 = vpop.f32.mrb[56].mxu0  ;;  %v2281_v31 = vsel %vm2249_vm7, %v2233_v16, %v2265_v25 }
 0x6e5   :  { %v2284_v32 = vsel %vm2252_vm8, %v2236_v23, %v2268_v44  ;;  %v2207_v47 = vadd.f32 %v2894_v35, %v2057_v19  ;;  %v2198_v27 = vpop.f32.mrb[57].mxu0  ;;  %2903 = vmatpush3.bf16.msra.mxu1 %v2296_v29  ;;  %v2077_v62 = vpop.permute.xlu0 %2076 }
 0x6e6   :  { %v2282_v48 = vsel %vm2250_vm9, %v2234_v26, %v2266_v45  ;;  %v2199_v34 = vadd.f32 %v2198_v27, %v2047_v55  ;;  %v2895_v38 = vpop.f32.mrb[58].mxu0  ;;  %2904 = vmatprep.subr.bf16.mxu1 %v3010_v46  ;;  %v2298_v33 = vpack.c.bf16 %v2284_v32, %v2283_v54 }
 0x6e7   :  { %v2239_v39 = vadd.f32 %v2207_v47, %v3742_v8  ;;  %v2210_v40 = vadd.f32 %v2895_v38, %v2062_v24  ;;  %v2201_v41 = vpop.f32.mrb[59].mxu0  ;;  %v2297_v42 = vpack.c.bf16 %v2282_v48, %v2281_v31 }
 0x6e8   :  { %v2237_v49 = vadd.f32 %v2199_v34, %v3730_v58  ;;  %v2202_v50 = vadd.f32 %v2201_v41, %v2052_v4 }
 0x6e9   :  { %v2271_v51 = vmul.f32 0.1, %v2239_v39  ;;  %v2240_v52 = vadd.f32 %v2210_v40, %v3735_v60  ;;  %2905 = vmatpush3.bf16.msra.mxu1 %v2297_v42  ;;  %vm2255_vm10 = vcmp.ge.f32.partialorder %v2239_v39, 0.0  ;;  %v2082_v60 = vpop.permute.xlu1 %2081  ;;  %v2308_v21 = vpop.permute.xlu0 %2307 }
 0x6ea   :  { %v2269_v53 = vmul.f32 0.1, %v2237_v49  ;;  %v2238_v28 = vadd.f32 %v2202_v50, %v3732_v2  ;;  %2906 = vmatprep.subr.bf16.mxu1 %v3010_v46  ;;  %vm2253_vm11 = vcmp.ge.f32.partialorder %v2237_v49, 0.0 }
 0x6eb   :  { %vm2256_vm12 = vcmp.ge.f32.partialorder %v2240_v52, 0.0  ;;  %v2272_v8 = vmul.f32 0.1, %v2240_v52  ;;  %v2287_v55 = vsel %vm2255_vm10, %v2239_v39, %v2271_v51 }
 0x6ec   :  { %vm2254_vm13 = vcmp.ge.f32.partialorder %v2238_v28, 0.0  ;;  %v2270_v9 = vmul.f32 0.1, %v2238_v28  ;;  %v2898_v1 = vpop.f32.mrb[60].mxu0  ;;  %v2285_v3 = vsel %vm2253_vm11, %v2237_v49, %v2269_v53 }
 0x6ed   :  { %v2288_v58 = vsel %vm2256_vm12, %v2240_v52, %v2272_v8  ;;  %v2223_v0 = vadd.f32 %v2898_v1, %v2077_v62  ;;  %v2214_v56 = vpop.f32.mrb[61].mxu0  ;;  %2907 = vmatpush3.bf16.msra.mxu1 %v2298_v33  ;;  %v2313_v25 = vpop.permute.xlu1 %2312 }
 0x6ee   :  { %v2286_v4 = vsel %vm2254_vm13, %v2238_v28, %v2270_v9  ;;  %v2215_v57 = vadd.f32 %v2214_v56, %v2067_v37  ;;  %v2899_v18 = vpop.f32.mrb[62].mxu0  ;;  %2908 = vmatprep.subr.bf16.mxu1 %v3010_v46  ;;  %v2300_v2 = vpack.c.bf16 %v2288_v58, %v2287_v55 }
 0x6ef   :  { %v2243_v59 = vadd.f32 %v2223_v0, %v3756_v20  ;;  %v2226_v63 = vadd.f32 %v2899_v18, %v2082_v60  ;;  %v2217_v61 = vpop.f32.mrb[63].mxu0  ;;  %v2299_v36 = vpack.c.bf16 %v2286_v4, %v2285_v3 }
 0x6f0   :  { %v2241_v11 = vadd.f32 %v2215_v57, %v3748_v15  ;;  %v2218_v5 = vadd.f32 %v2217_v61, %v2072_v43 }
 0x6f1   :  { %v2275_v30 = vmul.f32 0.1, %v2243_v59  ;;  %v2244_v6 = vadd.f32 %v2226_v63, %v3752_v7  ;;  %2909 = vmatpush3.bf16.msra.mxu1 %v2299_v36  ;;  %vm2259_vm14 = vcmp.ge.f32.partialorder %v2243_v59, 0.0 }
 0x6f2   :  { %v2273_v29 = vmul.f32 0.1, %v2241_v11  ;;  %v2242_v12 = vadd.f32 %v2218_v5, %v3750_v17  ;;  %2910 = vmatprep.subr.bf16.mxu1 %v3010_v46  ;;  %vm2257_vm15 = vcmp.ge.f32.partialorder %v2241_v11, 0.0  ;;  %v2984_v17 = vld [vmem:[%s3852_s7] sm:$0xff]  }
 0x6f3   :  { %vm2260_vm0 = vcmp.ge.f32.partialorder %v2244_v6, 0.0  ;;  %v2276_v13 = vmul.f32 0.1, %v2244_v6  ;;  %v2291_v10 = vsel %vm2259_vm14, %v2243_v59, %v2275_v30 }
 0x6f4   :  { %vm2258_vm1 = vcmp.ge.f32.partialorder %v2242_v12, 0.0  ;;  %v2274_v20 = vmul.f32 0.1, %v2242_v12  ;;  %v2289_v15 = vsel %vm2257_vm15, %v2241_v11, %v2273_v29 }
 0x6f5   :  { %v2292_v14 = vsel %vm2260_vm0, %v2244_v6, %v2276_v13  ;;  %2911 = vmatpush3.bf16.msra.mxu1 %v2300_v2 }
 0x6f6   :  { %v2290_v19 = vsel %vm2258_vm1, %v2242_v12, %v2274_v20  ;;  %2912 = vmatprep.subr.bf16.mxu1 %v3010_v46  ;;  %v2302_v7 = vpack.c.bf16 %v2292_v14, %v2291_v10 }
 0x6f7   :  { %v2301_v16 = vpack.c.bf16 %v2290_v19, %v2289_v15 }
 0x6f9   :  { %2913 = vmatpush3.bf16.msra.mxu1 %v2301_v16 }
 0x6fa   :  { %2914 = vmatprep.subr.bf16.mxu1 %v3010_v46 }
 0x6fd   :  { %2915 = vmatpush3.bf16.msra.mxu1 %v2302_v7 }
 0x700   :  { %2917 = vmatmul.mubr.bf16.vlgmr.msra.gmra.mrb[48].mxu1 %v2984_v17 }
 0x7d3   :  { %v2355_v22 = vpop.f32.mrb[48].mxu1 }
 0x7d4   :  { %v2356_v23 = vadd.f32 %v2355_v22, %v2308_v21  ;;  %v2918_v24 = vpop.f32.mrb[49].mxu1 }
 0x7d5   :  { %v2358_v26 = vpop.f32.mrb[50].mxu1 }
 0x7d6   :  { %v2362_v44 = vmax.f32 %v2356_v23, 0.0  ;;  %v2359_v45 = vadd.f32 %v2358_v26, %v2313_v25  ;;  %v2919_v35 = vpop.f32.mrb[51].mxu1 }
 0x7d8   :  { %2365 = vst.msk [vmem:[#allocation2] sm:$0xff] %vm2364_vm2, %v2362_v44  ;;  %v2363_v46 = vmax.f32 %v2359_v45, 0.0 }
 0x7da   :  { %2366 = vst.msk [vmem:[#allocation2 + $0x8] sm:$0xff] %vm2364_vm2, %v2363_v46 }
 0x7db   :  { %2996 = shalt.err (!%p2993_p4)
}
 0x7dc   :  { %s2997_s12 = scalar_lea.hbm %s3854_s9, 256 }
 0x7dd   :  { %p2998_p5 = scmp.ne.s32.totalorder %s3854_s9, %s2997_s12  ;;  %p3001_p6 = scmp.lt.u32.totalorder %s2997_s12, %s3854_s9 }
 0x7df   :  { %p3003_p7 = pnand %p3001_p6, %p2998_p5 }
 0x7e1   :  { %3006 = shalt.err (!%p3003_p7)
}
 0x7e2   :  { %s3013_s4 = smov 128   ;;  %s3014_s17 = smov 8  }
 0x7e3   :  { %2378 = dma.vmem_to_hbm [thread:$0]  %s2373_s30, 256, %s3854_s9, [#allocation3], %s3013_s4, %s3013_s4, %s3014_s17  }
 0x7e4   :  { %3007 = dma.done.wait [#allocation3], 256  }
 0x7e5   :  { %3008 = vsyncadd [#allocation3], 4294967040 }
 0x7e6   :  { %2382 = vsyncpa [#allocation3], 1 }

</bundles_post_ra>
